<compile_context>
chip_gen: v5e
topology: v5e:2x2
jax: 0.10.0
libtpu: 0.0.40
codegen_flags: <defaults>
</compile_context>

<pallas_src>
import jax
import jax.numpy as jnp
from jax.experimental import pallas as pl
from jax.experimental.pallas import tpu as pltpu
from jax.scipy.linalg import solve_triangular


def _round_up(x, m):
    return (x + m - 1) // m * m


# ----------------------------------------------------------------------------
# Pallas kernel: apply beamforming vector (complex dot over mics, per (f, t))
# ----------------------------------------------------------------------------
def _apply_bf_kernel(w_ref, x_ref, o_ref):
    # w_ref: (1, 2*M, TF, 1)   weights, channel 2m = re, 2m+1 = im, freqs on sublanes
    # x_ref: (1, 2*M, TF, TT)  mixture tile, frames on lanes
    # o_ref: (1, 2,   TF, TT)  output tile (re plane, im plane)
    n_mics = x_ref.shape[1] // 2
    acc_r = None
    acc_i = None
    # Short static unroll over mics: only two (TF, TT) accumulators stay live.
    for m in range(n_mics):
        wr = w_ref[0, 2 * m]          # (TF, 1) -> lane-broadcast against (TF, TT)
        wi = w_ref[0, 2 * m + 1]
        xr = x_ref[0, 2 * m]          # (TF, TT)
        xi = x_ref[0, 2 * m + 1]
        # conj(w) * x = (wr - i wi)(xr + i xi)
        pr = wr * xr + wi * xi
        pi = wr * xi - wi * xr
        acc_r = pr if acc_r is None else acc_r + pr
        acc_i = pi if acc_i is None else acc_i + pi
    o_ref[0, 0, :, :] = acc_r
    o_ref[0, 1, :, :] = acc_i


def _choose_tiles(n_mics, n_freqs, n_frames, x_block_budget_bytes=8 * 1024 * 1024):
    """Pick (TF, TT): TF multiple of 8 (sublanes), TT multiple of 128 (lanes)."""
    # Frames (lanes): at most 512, at least 128.
    tt = min(512, _round_up(n_frames, 128))
    # Freqs (sublanes): largest power-of-two candidate <= 256 with small pad waste.
    f8 = _round_up(n_freqs, 8)
    tf = 8
    for cand in (256, 128, 64, 32, 16, 8):
        if cand > f8:
            continue
        if _round_up(n_freqs, cand) - n_freqs <= max(n_freqs // 16, 8):
            tf = cand
            break

    def x_block_bytes(a, b):
        return 2 * n_mics * a * b * 4

    # Shrink to respect the per-block VMEM budget (keeps 2x double-buffered totals
    # comfortably under v7x's 64 MiB physical VMEM and the default scoped limits).
    while tf > 8 and x_block_bytes(tf, tt) > x_block_budget_bytes:
        tf = max(8, tf // 2)
    while tt > 128 and x_block_bytes(tf, tt) > x_block_budget_bytes:
        tt = max(128, tt // 2)
    return tf, tt


def apply_beamforming_vector_pallas(bf_vect, mix):
    """bf_vect: complex (B, M, F); mix: complex (B, M, F, T) -> complex (B, F, T)."""
    B, M, F, T = mix.shape
    TF, TT = _choose_tiles(M, F, T)
    Fp = _round_up(F, TF)
    Tp = _round_up(T, TT)

    # TODO(synk): this complex->planar split costs one extra HBM pass over `mix`;
    # Mosaic has no complex64 VMEM support and lax.bitcast_convert_type rejects
    # complex dtypes, so in a real pipeline the re/im planes should be produced
    # once at the STFT and kept split end-to-end.
    w_ri = jnp.stack([jnp.real(bf_vect), jnp.imag(bf_vect)], axis=2)      # (B, M, 2, F)
    w_ri = w_ri.reshape(B, 2 * M, F).astype(jnp.float32)
    w_ri = jnp.pad(w_ri, ((0, 0), (0, 0), (0, Fp - F)))[..., None]        # (B, 2M, Fp, 1)

    x_ri = jnp.stack([jnp.real(mix), jnp.imag(mix)], axis=2)              # (B, M, 2, F, T)
    x_ri = x_ri.reshape(B, 2 * M, F, T).astype(jnp.float32)
    x_ri = jnp.pad(x_ri, ((0, 0), (0, 0), (0, Fp - F), (0, Tp - T)))      # (B, 2M, Fp, Tp)

    grid = (B, Fp // TF, Tp // TT)

    # VMEM budget: double-buffered x + (lane-padded) w + out blocks, plus headroom.
    x_blk = 2 * M * TF * TT * 4
    w_blk = 2 * M * TF * 128 * 4          # the (TF, 1) weight tile pads to 128 lanes in VMEM
    o_blk = 2 * TF * TT * 4
    vmem_limit = int(min(max(2 * (x_blk + w_blk + o_blk) + (4 << 20), 32 << 20), 48 << 20))

    out = pl.pallas_call(
        _apply_bf_kernel,
        out_shape=jax.ShapeDtypeStruct((B, 2, Fp, Tp), jnp.float32),
        grid_spec=pltpu.PrefetchScalarGridSpec(
            num_scalar_prefetch=0,
            grid=grid,
            in_specs=[
                # Weights: invariant over the innermost frame-tile axis -> DMA'd once
                # per (batch, freq-tile) and kept resident across the frame loop.
                pl.BlockSpec((1, 2 * M, TF, 1), lambda b, fi, ti: (b, 0, fi, 0)),
                pl.BlockSpec((1, 2 * M, TF, TT), lambda b, fi, ti: (b, 0, fi, ti)),
            ],
            out_specs=pl.BlockSpec((1, 2, TF, TT), lambda b, fi, ti: (b, 0, fi, ti)),
        ),
        compiler_params=pltpu.CompilerParams(
            dimension_semantics=("parallel", "parallel", "arbitrary"),
            vmem_limit_bytes=vmem_limit,
        ),
    )(w_ri, x_ri)

    out = out[:, :, :F, :T]
    return jax.lax.complex(out[:, 0], out[:, 1])


# ----------------------------------------------------------------------------
# GEVD beamforming-vector computation (plain JAX: cholesky / eigh / solves)
# ----------------------------------------------------------------------------
def _hermitian(x):
    return jnp.conj(jnp.swapaxes(x, -1, -2))


def _condition_scm(x, eps=1e-6):
    m = x.shape[-1]
    trace = jnp.trace(x, axis1=-2, axis2=-1)[..., None, None]
    eye = jnp.eye(m, dtype=x.dtype)
    return (x + eye * (eps * trace / m)) / (1.0 + eps)


def _stable_cholesky(b, eps=1e-6):
    """Cholesky with diagonal-loading fallback (mirrors asteroid's stable_cholesky)."""
    chol = jnp.linalg.cholesky(b)
    bad = jnp.any(~jnp.isfinite(jnp.real(chol)) | ~jnp.isfinite(jnp.imag(chol)),
                  axis=(-2, -1), keepdims=True)
    chol_cond = jnp.linalg.cholesky(_condition_scm(b, eps))
    return jnp.where(bad, chol_cond, chol)


def _generalized_eigenvalue_decomposition(a, b):
    # a, b: (B, F, M, M) complex, b Hermitian PD.
    # TODO(synk): torch performs this in complex128 (USE_DOUBLE); kept complex64 here
    # since x64 is disabled by default on TPU.
    chol = _stable_cholesky(b)
    # cmat = L^{-1} a L^{-H} via two triangular solves (no explicit inverse).
    y = solve_triangular(chol, a, lower=True)                       # L^{-1} a
    cmat = _hermitian(solve_triangular(chol, _hermitian(y), lower=True))
    e_val, e_vec = jnp.linalg.eigh(cmat)                            # ascending eigenvalues
    # e_vec <- L^{-H} e_vec  (triangular solve with L^H, upper)
    e_vec = solve_triangular(_hermitian(chol), e_vec, lower=False)
    return e_val, e_vec


def compute_beamforming_vector(target_scm, noise_scm, mu=1.0, rank=1):
    """target_scm, noise_scm: complex (B, M, M, F) -> bf_vect complex (B, M, F)."""
    a = jnp.transpose(target_scm, (0, 3, 1, 2))   # (B, F, M, M)
    b = jnp.transpose(noise_scm, (0, 3, 1, 2))
    e_val, e_vec = _generalized_eigenvalue_decomposition(a, b)

    m = a.shape[-1]
    eps = jnp.finfo(e_val.dtype).eps
    e_val = jnp.clip(e_val, eps, 1.0e6)
    e_val = e_val[..., ::-1]                      # descending (torch.flip)
    e_vec = e_vec[..., ::-1]
    if rank:
        keep = (jnp.arange(m) < rank).astype(e_val.dtype)
        e_val = e_val * keep                      # zero diag entries >= rank

    eye = jnp.eye(m, dtype=e_val.dtype)
    ev_diag = e_val[..., :, None] * eye           # diag_embed, (B, F, M, M)
    ev_plus_mu = ev_diag + mu * eye

    cdtype = e_vec.dtype
    num = e_vec @ ev_diag.astype(cdtype)          # V D
    den = e_vec @ ev_plus_mu.astype(cdtype)       # V (D + mu I)
    # bf_mat[..., 0] = num @ inv(den) @ e0  ==  num @ solve(den, e0): single-RHS solve
    # instead of a full matrix inverse (cheaper, better conditioned).
    e0 = jnp.zeros((m, 1), dtype=cdtype).at[0, 0].set(1.0)
    rhs = jnp.broadcast_to(e0, den.shape[:-2] + (m, 1))
    bf_vect = (num @ jnp.linalg.solve(den, rhs))[..., 0]   # (B, F, M)
    return jnp.transpose(bf_vect, (0, 2, 1))               # (B, M, F)


def gevd_beamformer_forward(mix, target_scm, noise_scm, mu=1.0, rank=1):
    bf_vect = compute_beamforming_vector(target_scm, noise_scm, mu=mu, rank=rank)
    return apply_beamforming_vector_pallas(bf_vect, mix)


# ----------------------------------------------------------------------------
# Demo / check
# ----------------------------------------------------------------------------
def _rand_complex(key, shape):
    kr, ki = jax.random.split(key)
    return (jax.random.normal(kr, shape, dtype=jnp.float32)
            + 1j * jax.random.normal(ki, shape, dtype=jnp.float32)).astype(jnp.complex64)


if __name__ == "__main__":
    B, M, F, T = 2, 4, 16, 8      # batch, mics, freqs, frames
    SNAP = 8                      # snapshots used to build the SCMs

    key = jax.random.PRNGKey(0)
    k_mix, k_tgt, k_nse = jax.random.split(key, 3)

    mix = _rand_complex(k_mix, (B, M, F, T))

    # Hermitian PSD spatial covariance matrices, shape (batch, mics, mics, freqs)
    s = _rand_complex(k_tgt, (B, M, SNAP, F))
    target_scm = jnp.einsum("bmkf,bnkf->bmnf", s, jnp.conj(s)) / SNAP
    n = _rand_complex(k_nse, (B, M, SNAP, F))
    noise_scm = jnp.einsum("bmkf,bnkf->bmnf", n, jnp.conj(n)) / SNAP
    noise_scm = noise_scm + 1e-2 * jnp.eye(M, dtype=jnp.complex64)[None, :, :, None]

    fwd = jax.jit(gevd_beamformer_forward, static_argnames=("mu", "rank"))
    out = fwd(mix, target_scm, noise_scm, mu=1.0, rank=1)
    out = jax.block_until_ready(out)

    # Sanity check of the Pallas hot path against a pure-JAX einsum reference.
    bf_vect = compute_beamforming_vector(target_scm, noise_scm, mu=1.0, rank=1)
    ref = jnp.einsum("bmf,bmft->bft", jnp.conj(bf_vect), mix)
    assert out.shape == (B, F, T) and out.dtype == jnp.complex64
    assert bool(jnp.all(jnp.isfinite(jnp.real(out)) & jnp.isfinite(jnp.imag(out))))
    assert jnp.allclose(out, ref, atol=1e-4, rtol=1e-4), "Pallas output mismatch"

    print("KERNEL_OK")
</pallas_src>

<mosaic_0001>
module attributes {stable_mosaic.version = 11 : i64} {
  func.func @_apply_bf_kernel(%arg0: i32, %arg1: i32, %arg2: i32, %arg3: memref<1x8x16x1xf32, #tpu.memory_space<vmem>>, %arg4: memref<1x8x16x128xf32, #tpu.memory_space<vmem>>, %arg5: memref<1x2x16x128xf32, #tpu.memory_space<vmem>>) attributes {dimension_semantics = [#tpu.dimension_semantics<parallel>, #tpu.dimension_semantics<parallel>, #tpu.dimension_semantics<arbitrary>], iteration_bounds = array<i64: 2, 1, 1>, scalar_prefetch = 0 : i64, scratch_operands = 0 : i64, tpu.core_type = #tpu.core_type<tc>, window_params = [{transform_indices = @transform_0, window_bounds = array<i64: 1, 8, 16, 1>}, {transform_indices = @transform_1, window_bounds = array<i64: 1, 8, 16, 128>}, {transform_indices = @transform_2, window_bounds = array<i64: 1, 2, 16, 128>}]} {
    %c0 = arith.constant 0 : index
    %c0_0 = arith.constant 0 : index
    %c0_1 = arith.constant 0 : index
    %c0_2 = arith.constant 0 : index
    %0 = vector.load %arg3[%c0, %c0_0, %c0_1, %c0_2] : memref<1x8x16x1xf32, #tpu.memory_space<vmem>>, vector<1x1x16x1xf32>
    %1 = vector.shape_cast %0 : vector<1x1x16x1xf32> to vector<16x1xf32>
    %c0_3 = arith.constant 0 : index
    %c1 = arith.constant 1 : index
    %c0_4 = arith.constant 0 : index
    %c0_5 = arith.constant 0 : index
    %2 = vector.load %arg3[%c0_3, %c1, %c0_4, %c0_5] : memref<1x8x16x1xf32, #tpu.memory_space<vmem>>, vector<1x1x16x1xf32>
    %3 = vector.shape_cast %2 : vector<1x1x16x1xf32> to vector<16x1xf32>
    %c0_6 = arith.constant 0 : index
    %c0_7 = arith.constant 0 : index
    %c0_8 = arith.constant 0 : index
    %c0_9 = arith.constant 0 : index
    %4 = vector.load %arg4[%c0_6, %c0_7, %c0_8, %c0_9] : memref<1x8x16x128xf32, #tpu.memory_space<vmem>>, vector<1x1x16x128xf32>
    %5 = vector.shape_cast %4 : vector<1x1x16x128xf32> to vector<16x128xf32>
    %c0_10 = arith.constant 0 : index
    %c1_11 = arith.constant 1 : index
    %c0_12 = arith.constant 0 : index
    %c0_13 = arith.constant 0 : index
    %6 = vector.load %arg4[%c0_10, %c1_11, %c0_12, %c0_13] : memref<1x8x16x128xf32, #tpu.memory_space<vmem>>, vector<1x1x16x128xf32>
    %7 = vector.shape_cast %6 : vector<1x1x16x128xf32> to vector<16x128xf32>
    %8 = vector.broadcast %1 : vector<16x1xf32> to vector<16x128xf32>
    %9 = arith.mulf %8, %5 : vector<16x128xf32>
    %10 = vector.broadcast %3 : vector<16x1xf32> to vector<16x128xf32>
    %11 = arith.mulf %10, %7 : vector<16x128xf32>
    %12 = arith.addf %9, %11 : vector<16x128xf32>
    %13 = vector.broadcast %1 : vector<16x1xf32> to vector<16x128xf32>
    %14 = arith.mulf %13, %7 : vector<16x128xf32>
    %15 = vector.broadcast %3 : vector<16x1xf32> to vector<16x128xf32>
    %16 = arith.mulf %15, %5 : vector<16x128xf32>
    %17 = arith.subf %14, %16 : vector<16x128xf32>
    %c0_14 = arith.constant 0 : index
    %c2 = arith.constant 2 : index
    %c0_15 = arith.constant 0 : index
    %c0_16 = arith.constant 0 : index
    %18 = vector.load %arg3[%c0_14, %c2, %c0_15, %c0_16] : memref<1x8x16x1xf32, #tpu.memory_space<vmem>>, vector<1x1x16x1xf32>
    %19 = vector.shape_cast %18 : vector<1x1x16x1xf32> to vector<16x1xf32>
    %c0_17 = arith.constant 0 : index
    %c3 = arith.constant 3 : index
    %c0_18 = arith.constant 0 : index
    %c0_19 = arith.constant 0 : index
    %20 = vector.load %arg3[%c0_17, %c3, %c0_18, %c0_19] : memref<1x8x16x1xf32, #tpu.memory_space<vmem>>, vector<1x1x16x1xf32>
    %21 = vector.shape_cast %20 : vector<1x1x16x1xf32> to vector<16x1xf32>
    %c0_20 = arith.constant 0 : index
    %c2_21 = arith.constant 2 : index
    %c0_22 = arith.constant 0 : index
    %c0_23 = arith.constant 0 : index
    %22 = vector.load %arg4[%c0_20, %c2_21, %c0_22, %c0_23] : memref<1x8x16x128xf32, #tpu.memory_space<vmem>>, vector<1x1x16x128xf32>
    %23 = vector.shape_cast %22 : vector<1x1x16x128xf32> to vector<16x128xf32>
    %c0_24 = arith.constant 0 : index
    %c3_25 = arith.constant 3 : index
    %c0_26 = arith.constant 0 : index
    %c0_27 = arith.constant 0 : index
    %24 = vector.load %arg4[%c0_24, %c3_25, %c0_26, %c0_27] : memref<1x8x16x128xf32, #tpu.memory_space<vmem>>, vector<1x1x16x128xf32>
    %25 = vector.shape_cast %24 : vector<1x1x16x128xf32> to vector<16x128xf32>
    %26 = vector.broadcast %19 : vector<16x1xf32> to vector<16x128xf32>
    %27 = arith.mulf %26, %23 : vector<16x128xf32>
    %28 = vector.broadcast %21 : vector<16x1xf32> to vector<16x128xf32>
    %29 = arith.mulf %28, %25 : vector<16x128xf32>
    %30 = arith.addf %27, %29 : vector<16x128xf32>
    %31 = vector.broadcast %19 : vector<16x1xf32> to vector<16x128xf32>
    %32 = arith.mulf %31, %25 : vector<16x128xf32>
    %33 = vector.broadcast %21 : vector<16x1xf32> to vector<16x128xf32>
    %34 = arith.mulf %33, %23 : vector<16x128xf32>
    %35 = arith.subf %32, %34 : vector<16x128xf32>
    %36 = arith.addf %12, %30 : vector<16x128xf32>
    %37 = arith.addf %17, %35 : vector<16x128xf32>
    %c0_28 = arith.constant 0 : index
    %c4 = arith.constant 4 : index
    %c0_29 = arith.constant 0 : index
    %c0_30 = arith.constant 0 : index
    %38 = vector.load %arg3[%c0_28, %c4, %c0_29, %c0_30] : memref<1x8x16x1xf32, #tpu.memory_space<vmem>>, vector<1x1x16x1xf32>
    %39 = vector.shape_cast %38 : vector<1x1x16x1xf32> to vector<16x1xf32>
    %c0_31 = arith.constant 0 : index
    %c5 = arith.constant 5 : index
    %c0_32 = arith.constant 0 : index
    %c0_33 = arith.constant 0 : index
    %40 = vector.load %arg3[%c0_31, %c5, %c0_32, %c0_33] : memref<1x8x16x1xf32, #tpu.memory_space<vmem>>, vector<1x1x16x1xf32>
    %41 = vector.shape_cast %40 : vector<1x1x16x1xf32> to vector<16x1xf32>
    %c0_34 = arith.constant 0 : index
    %c4_35 = arith.constant 4 : index
    %c0_36 = arith.constant 0 : index
    %c0_37 = arith.constant 0 : index
    %42 = vector.load %arg4[%c0_34, %c4_35, %c0_36, %c0_37] : memref<1x8x16x128xf32, #tpu.memory_space<vmem>>, vector<1x1x16x128xf32>
    %43 = vector.shape_cast %42 : vector<1x1x16x128xf32> to vector<16x128xf32>
    %c0_38 = arith.constant 0 : index
    %c5_39 = arith.constant 5 : index
    %c0_40 = arith.constant 0 : index
    %c0_41 = arith.constant 0 : index
    %44 = vector.load %arg4[%c0_38, %c5_39, %c0_40, %c0_41] : memref<1x8x16x128xf32, #tpu.memory_space<vmem>>, vector<1x1x16x128xf32>
    %45 = vector.shape_cast %44 : vector<1x1x16x128xf32> to vector<16x128xf32>
    %46 = vector.broadcast %39 : vector<16x1xf32> to vector<16x128xf32>
    %47 = arith.mulf %46, %43 : vector<16x128xf32>
    %48 = vector.broadcast %41 : vector<16x1xf32> to vector<16x128xf32>
    %49 = arith.mulf %48, %45 : vector<16x128xf32>
    %50 = arith.addf %47, %49 : vector<16x128xf32>
    %51 = vector.broadcast %39 : vector<16x1xf32> to vector<16x128xf32>
    %52 = arith.mulf %51, %45 : vector<16x128xf32>
    %53 = vector.broadcast %41 : vector<16x1xf32> to vector<16x128xf32>
    %54 = arith.mulf %53, %43 : vector<16x128xf32>
    %55 = arith.subf %52, %54 : vector<16x128xf32>
    %56 = arith.addf %36, %50 : vector<16x128xf32>
    %57 = arith.addf %37, %55 : vector<16x128xf32>
    %c0_42 = arith.constant 0 : index
    %c6 = arith.constant 6 : index
    %c0_43 = arith.constant 0 : index
    %c0_44 = arith.constant 0 : index
    %58 = vector.load %arg3[%c0_42, %c6, %c0_43, %c0_44] : memref<1x8x16x1xf32, #tpu.memory_space<vmem>>, vector<1x1x16x1xf32>
    %59 = vector.shape_cast %58 : vector<1x1x16x1xf32> to vector<16x1xf32>
    %c0_45 = arith.constant 0 : index
    %c7 = arith.constant 7 : index
    %c0_46 = arith.constant 0 : index
    %c0_47 = arith.constant 0 : index
    %60 = vector.load %arg3[%c0_45, %c7, %c0_46, %c0_47] : memref<1x8x16x1xf32, #tpu.memory_space<vmem>>, vector<1x1x16x1xf32>
    %61 = vector.shape_cast %60 : vector<1x1x16x1xf32> to vector<16x1xf32>
    %c0_48 = arith.constant 0 : index
    %c6_49 = arith.constant 6 : index
    %c0_50 = arith.constant 0 : index
    %c0_51 = arith.constant 0 : index
    %62 = vector.load %arg4[%c0_48, %c6_49, %c0_50, %c0_51] : memref<1x8x16x128xf32, #tpu.memory_space<vmem>>, vector<1x1x16x128xf32>
    %63 = vector.shape_cast %62 : vector<1x1x16x128xf32> to vector<16x128xf32>
    %c0_52 = arith.constant 0 : index
    %c7_53 = arith.constant 7 : index
    %c0_54 = arith.constant 0 : index
    %c0_55 = arith.constant 0 : index
    %64 = vector.load %arg4[%c0_52, %c7_53, %c0_54, %c0_55] : memref<1x8x16x128xf32, #tpu.memory_space<vmem>>, vector<1x1x16x128xf32>
    %65 = vector.shape_cast %64 : vector<1x1x16x128xf32> to vector<16x128xf32>
    %66 = vector.broadcast %59 : vector<16x1xf32> to vector<16x128xf32>
    %67 = arith.mulf %66, %63 : vector<16x128xf32>
    %68 = vector.broadcast %61 : vector<16x1xf32> to vector<16x128xf32>
    %69 = arith.mulf %68, %65 : vector<16x128xf32>
    %70 = arith.addf %67, %69 : vector<16x128xf32>
    %71 = vector.broadcast %59 : vector<16x1xf32> to vector<16x128xf32>
    %72 = arith.mulf %71, %65 : vector<16x128xf32>
    %73 = vector.broadcast %61 : vector<16x1xf32> to vector<16x128xf32>
    %74 = arith.mulf %73, %63 : vector<16x128xf32>
    %75 = arith.subf %72, %74 : vector<16x128xf32>
    %76 = arith.addf %56, %70 : vector<16x128xf32>
    %77 = arith.addf %57, %75 : vector<16x128xf32>
    %c0_56 = arith.constant 0 : index
    %c0_57 = arith.constant 0 : index
    %c0_58 = arith.constant 0 : index
    %c0_59 = arith.constant 0 : index
    %78 = vector.load %arg5[%c0_56, %c0_57, %c0_58, %c0_59] : memref<1x2x16x128xf32, #tpu.memory_space<vmem>>, vector<1x1x16x128xf32>
    %79 = vector.shape_cast %78 : vector<1x1x16x128xf32> to vector<16x128xf32>
    %80 = vector.shape_cast %76 : vector<16x128xf32> to vector<1x1x16x128xf32>
    tpu.vector_store %arg5[%c0_56, %c0_57, %c0_58, %c0_59], %80 {strides = array<i32>} : memref<1x2x16x128xf32, #tpu.memory_space<vmem>>, vector<1x1x16x128xf32>,
    %c0_60 = arith.constant 0 : index
    %c1_61 = arith.constant 1 : index
    %c0_62 = arith.constant 0 : index
    %c0_63 = arith.constant 0 : index
    %81 = vector.load %arg5[%c0_60, %c1_61, %c0_62, %c0_63] : memref<1x2x16x128xf32, #tpu.memory_space<vmem>>, vector<1x1x16x128xf32>
    %82 = vector.shape_cast %81 : vector<1x1x16x128xf32> to vector<16x128xf32>
    %83 = vector.shape_cast %77 : vector<16x128xf32> to vector<1x1x16x128xf32>
    tpu.vector_store %arg5[%c0_60, %c1_61, %c0_62, %c0_63], %83 {strides = array<i32>} : memref<1x2x16x128xf32, #tpu.memory_space<vmem>>, vector<1x1x16x128xf32>,
    return
  }
  func.func @transform_0(%arg0: i32, %arg1: i32, %arg2: i32) -> (i32, i32, i32, i32) {
    %c0_i32 = arith.constant 0 : i32
    %c0_i32_0 = arith.constant 0 : i32
    %c0_i32_1 = arith.constant 0 : i32
    return %arg0, %c0_i32, %arg1, %c0_i32_0 : i32, i32, i32, i32
  }
  func.func @transform_1(%arg0: i32, %arg1: i32, %arg2: i32) -> (i32, i32, i32, i32) {
    %c0_i32 = arith.constant 0 : i32
    %c0_i32_0 = arith.constant 0 : i32
    return %arg0, %c0_i32, %arg1, %arg2 : i32, i32, i32, i32
  }
  func.func @transform_2(%arg0: i32, %arg1: i32, %arg2: i32) -> (i32, i32, i32, i32) {
    %c0_i32 = arith.constant 0 : i32
    %c0_i32_0 = arith.constant 0 : i32
    return %arg0, %c0_i32, %arg1, %arg2 : i32, i32, i32, i32
  }
}

</mosaic_0001>

<bundles_post_ra>
// kernel: custom-call.1
= control target key start
LH: loop header
LB: loop body
LE: loop exit
PB: predicated region body
PF: predicated region fallthrough
CT: control target
= control target key end

     0   :  { %s217_s0 = inlined_call_operand.vmem [shape: c64[2,4,4,16], index: 0, kind: input, shape index: {}]   ;;  %s218_s1 = inlined_call_operand.vmem [shape: f32[2,4,4,16], index: 1, kind: output, shape index: {}]  }
   0x1   :  { %v80_v0 = vld [vmem:[%s217_s0 + $0x80] sm:$0xff]  ;;  %v81_v1 = vld [vmem:[%s217_s0 + $0x88] sm:$0xff]  ;;  %v83_v2 = vld [vmem:[%s217_s0 + $0x90] sm:$0xff] }
   0x2   :  { %4 = vst [vmem:[%s218_s1] sm:$0xff] %v80_v0  ;;  %v85_v3 = vld [vmem:[%s217_s0 + $0x98] sm:$0xff]  ;;  %v87_v4 = vld [vmem:[%s217_s0 + $0xa0] sm:$0xff]  ;;  %v89_v5 = vld [vmem:[%s217_s0 + $0xa8] sm:$0xff] }
   0x3   :  { %82 = vst [vmem:[%s218_s1 + $0x8] sm:$0xff] %v81_v1  ;;  %v91_v6 = vld [vmem:[%s217_s0 + $0xb0] sm:$0xff]  ;;  %v93_v7 = vld [vmem:[%s217_s0 + $0xb8] sm:$0xff]  ;;  %v95_v8 = vld [vmem:[%s217_s0 + $0xc0] sm:$0xff] }
   0x4   :  { %84 = vst [vmem:[%s218_s1 + $0x10] sm:$0xff] %v83_v2  ;;  %v97_v9 = vld [vmem:[%s217_s0 + $0xc8] sm:$0xff]  ;;  %v99_v10 = vld [vmem:[%s217_s0 + $0xd0] sm:$0xff]  ;;  %v101_v11 = vld [vmem:[%s217_s0 + $0xd8] sm:$0xff] }
   0x5   :  { %86 = vst [vmem:[%s218_s1 + $0x18] sm:$0xff] %v85_v3  ;;  %v103_v12 = vld [vmem:[%s217_s0 + $0xe0] sm:$0xff]  ;;  %v105_v13 = vld [vmem:[%s217_s0 + $0xe8] sm:$0xff]  ;;  %v107_v14 = vld [vmem:[%s217_s0 + $0xf0] sm:$0xff] }
   0x6   :  { %88 = vst [vmem:[%s218_s1 + $0x20] sm:$0xff] %v87_v4  ;;  %v109_v15 = vld [vmem:[%s217_s0 + $0xf8] sm:$0xff] }
   0x7   :  { %90 = vst [vmem:[%s218_s1 + $0x28] sm:$0xff] %v89_v5 }
   0x8   :  { %92 = vst [vmem:[%s218_s1 + $0x30] sm:$0xff] %v91_v6 }
   0x9   :  { %94 = vst [vmem:[%s218_s1 + $0x38] sm:$0xff] %v93_v7 }
   0xa   :  { %96 = vst [vmem:[%s218_s1 + $0x40] sm:$0xff] %v95_v8 }
   0xb   :  { %98 = vst [vmem:[%s218_s1 + $0x48] sm:$0xff] %v97_v9 }
   0xc   :  { %100 = vst [vmem:[%s218_s1 + $0x50] sm:$0xff] %v99_v10 }
   0xd   :  { %102 = vst [vmem:[%s218_s1 + $0x58] sm:$0xff] %v101_v11 }
   0xe   :  { %104 = vst [vmem:[%s218_s1 + $0x60] sm:$0xff] %v103_v12 }
   0xf   :  { %106 = vst [vmem:[%s218_s1 + $0x68] sm:$0xff] %v105_v13 }
  0x10   :  { %108 = vst [vmem:[%s218_s1 + $0x70] sm:$0xff] %v107_v14 }
  0x11   :  { %110 = vst [vmem:[%s218_s1 + $0x78] sm:$0xff] %v109_v15 }

// kernel: custom-call
= control target key start
LH: loop header
LB: loop body
LE: loop exit
PB: predicated region body
PF: predicated region fallthrough
CT: control target
= control target key end

     0   :  { %s200_s0 = inlined_call_operand.vmem [shape: c64[2,4,4,16], index: 0, kind: input, shape index: {}]   ;;  %s201_s1 = inlined_call_operand.vmem [shape: f32[2,4,4,16], index: 1, kind: output, shape index: {}]  }
   0x1   :  { %v2_v0 = vld [vmem:[%s200_s0] sm:$0xff]  ;;  %v64_v1 = vld [vmem:[%s200_s0 + $0x8] sm:$0xff]  ;;  %v66_v2 = vld [vmem:[%s200_s0 + $0x10] sm:$0xff] }
   0x2   :  { %3 = vst [vmem:[%s201_s1] sm:$0xff] %v2_v0  ;;  %v68_v3 = vld [vmem:[%s200_s0 + $0x18] sm:$0xff]  ;;  %v70_v4 = vld [vmem:[%s200_s0 + $0x20] sm:$0xff]  ;;  %v72_v5 = vld [vmem:[%s200_s0 + $0x28] sm:$0xff] }
   0x3   :  { %65 = vst [vmem:[%s201_s1 + $0x8] sm:$0xff] %v64_v1  ;;  %v74_v6 = vld [vmem:[%s200_s0 + $0x30] sm:$0xff]  ;;  %v76_v7 = vld [vmem:[%s200_s0 + $0x38] sm:$0xff]  ;;  %v78_v8 = vld [vmem:[%s200_s0 + $0x40] sm:$0xff] }
   0x4   :  { %67 = vst [vmem:[%s201_s1 + $0x10] sm:$0xff] %v66_v2  ;;  %v80_v9 = vld [vmem:[%s200_s0 + $0x48] sm:$0xff]  ;;  %v82_v10 = vld [vmem:[%s200_s0 + $0x50] sm:$0xff]  ;;  %v84_v11 = vld [vmem:[%s200_s0 + $0x58] sm:$0xff] }
   0x5   :  { %69 = vst [vmem:[%s201_s1 + $0x18] sm:$0xff] %v68_v3  ;;  %v86_v12 = vld [vmem:[%s200_s0 + $0x60] sm:$0xff]  ;;  %v88_v13 = vld [vmem:[%s200_s0 + $0x68] sm:$0xff]  ;;  %v90_v14 = vld [vmem:[%s200_s0 + $0x70] sm:$0xff] }
   0x6   :  { %71 = vst [vmem:[%s201_s1 + $0x20] sm:$0xff] %v70_v4  ;;  %v92_v15 = vld [vmem:[%s200_s0 + $0x78] sm:$0xff] }
   0x7   :  { %73 = vst [vmem:[%s201_s1 + $0x28] sm:$0xff] %v72_v5 }
   0x8   :  { %75 = vst [vmem:[%s201_s1 + $0x30] sm:$0xff] %v74_v6 }
   0x9   :  { %77 = vst [vmem:[%s201_s1 + $0x38] sm:$0xff] %v76_v7 }
   0xa   :  { %79 = vst [vmem:[%s201_s1 + $0x40] sm:$0xff] %v78_v8 }
   0xb   :  { %81 = vst [vmem:[%s201_s1 + $0x48] sm:$0xff] %v80_v9 }
   0xc   :  { %83 = vst [vmem:[%s201_s1 + $0x50] sm:$0xff] %v82_v10 }
   0xd   :  { %85 = vst [vmem:[%s201_s1 + $0x58] sm:$0xff] %v84_v11 }
   0xe   :  { %87 = vst [vmem:[%s201_s1 + $0x60] sm:$0xff] %v86_v12 }
   0xf   :  { %89 = vst [vmem:[%s201_s1 + $0x68] sm:$0xff] %v88_v13 }
  0x10   :  { %91 = vst [vmem:[%s201_s1 + $0x70] sm:$0xff] %v90_v14 }
  0x11   :  { %93 = vst [vmem:[%s201_s1 + $0x78] sm:$0xff] %v92_v15 }

// kernel: custom-call.22
= control target key start
LH: loop header
LB: loop body
LE: loop exit
PB: predicated region body
PF: predicated region fallthrough
CT: control target
= control target key end

     0   :  { %s790_s12 = smov 0   ;;  %s792_s13 = smov 0   ;;  %s878_s0 = inlined_call_operand.vmem [shape: f32[2,16,4,4], index: 0, kind: input, shape index: {}]   ;;  %s879_s1 = inlined_call_operand.vmem [shape: f32[2,16,4,4], index: 1, kind: input, shape index: {}]   ;;  %s880_s2 = inlined_call_operand.vmem [shape: f32[2,16,4,4], index: 2, kind: output, shape index: {0}]   ;;  %s881_s3 = inlined_call_operand.vmem [shape: f32[2,16,4,4], index: 3, kind: output, shape index: {1}]  }
   0x1   :  { %s794_s14 = smov 0   ;;  %s796_s15 = smov 0  }
   0x2   :  { %s798_s16 = smov 0  }
   0x3 LB: > { %s658_s17 = sadd.s32 4294967295, %s767_s16   ;;  %s32_s18 = sadd.s32 1, %s759_s14  ;;  %s767_s16 = sphi %s798_s16, %s10_s16   ;;  %s763_s15 = sphi %s796_s15, %s885_s15   ;;  %s759_s14 = sphi %s794_s14, %s884_s14   ;;  %s755_s13 = sphi %s792_s13, %s883_s13   ;;  %s751_s12 = sphi %s790_s12, %s882_s12  }
   0x4   : > { %p34_p0 = scmp.ge.s32.totalorder %s32_s18, 16  ;;  %s36_s19 = sadd.s32 1, %s763_s15 }
   0x5   : > { %p660_p2 = scmp.ge.s32.totalorder %s767_s16, 32 }
   0x6   : > { %s887_s18 = smov (%p34_p0, %s32_s18), 0  ;;  %s889_s19 = smov (!%p34_p0, %s36_s19), %s763_s15 }
   0x7   : > { %p38_p1 = scmp.ge.s32.totalorder %s889_s19, 2  ;;  %50 = sbr.rel (%p660_p2) target bundleno = 16 (0x10), region = 16 }
   0x8   : > { %s52_s20 = sand.u32 (!%p660_p2), 1, %s767_s16   ;;  %s662_s21 = sshll.u32 (!%p660_p2), %s763_s15, 4 }
   0x9   : > { %s891_s19 = smov (%p38_p1, %s889_s19), 0  ;;  %s661_s22 = sshll.u32 (!%p660_p2), %s52_s20, 2 }
   0xa   : > { %s58_s23 = sadd.s32 (!%p660_p2), %s759_s14, %s662_s21  ;;  %s54_s4 = scalar_lea.vmem (!%p660_p2), [#allocation1], %s661_s22 }
   0xb   : > { %s663_s24 = sshll.u32 (!%p660_p2), %s58_s23, 2  ;;  %s97_s5 = scalar_lea.vmem (!%p660_p2), [#allocation5], %s661_s22 }
   0xc   : > { %s60_s27 = scalar_lea.vmem %s878_s0, %s663_s24  ;;  %s103_s30 = scalar_lea.vmem %s879_s1, %s663_s24 }
   0xd   : > { %v77_v0 = vld [vmem:[%s60_s27] sm:$0xf] }
   0xe   : > { %78 = vst [vmem:[%s54_s4] sm:$0xf] %v77_v0  ;;  %v120_v1 = vld [vmem:[%s103_s30] sm:$0xf] }
   0xf   : > { %121 = vst [vmem:[%s97_s5] sm:$0xf] %v120_v1 }
  0x10 PF: > { %p667_p3 = scmp.ge.s32.totalorder %s767_s16, 1  ;;  %p138_p4 = scmp.lt.s32.totalorder %s767_s16, 33 }
  0x12   : > { %p139_p5 = pnand %p667_p3, %p138_p4 }
  0x13   : > { %s153_s6 = sand.u32 (!%p139_p5), 1, %s658_s17   ;;  %s674_s10 = sshll.u32 (!%p139_p5), %s755_s13, 4 }
  0x14   : > { %142 = sbr.rel (%p139_p5) target bundleno = 676 (0x2a4), region = 80  ;;  %s837_s7 = sshll.u32 (!%p139_p5), %s153_s6, 2 }
  0x15   : > { %s155_s8 = scalar_lea.vmem (!%p139_p5), [#allocation1], %s837_s7  ;;  %s159_s9 = scalar_lea.vmem (!%p139_p5), [#allocation5], %s837_s7 }
  0x16   : > { %s483_s11 = sadd.s32 (!%p139_p5), %s751_s12, %s674_s10  ;;  %s163_s17 = scalar_lea.vmem (!%p139_p5), [#allocation3], %s837_s7 }
  0x17   : > { %s167_s20 = scalar_lea.vmem (!%p139_p5), [#allocation7], %s837_s7  ;;  %s675_s21 = sshll.u32 (!%p139_p5), %s483_s11, 2 }
  0x18   : > { %s485_s24 = scalar_lea.vmem (!%p139_p5), %s880_s2, %s675_s21  ;;  %s524_s27 = scalar_lea.vmem (!%p139_p5), %s881_s3, %s675_s21 }
  0x19   : > { %v769_v2 = vmov 0.0   ;;  %v170_v13 = vld [vmem:[%s155_s8] sm:$0xf]  ;;  %vm178_vm3 = vcmask 7168   ;;  %vm244_vm6 = vcmask 15368   ;;  %vm308_vm7 = vcmask 1047553  }
  0x1a   : > { %176 = vst [vmem:[#allocation2] sm:$0xff] %v769_v2  ;;  %v174_v14 = vld [vmem:[%s159_s9] sm:$0xf]  ;;  %vm309_vm9 = vmand %vm244_vm6, %vm308_vm7  ;;  %vm316_vm12 = vcmask 23568   ;;  %vm380_vm13 = vcmask 1047554  }
  0x1b   : > { %177 = vst [vmem:[#allocation6] sm:$0xff] %v769_v2  ;;  %vm381_vm15 = vmand %vm316_vm12, %vm380_vm13 }
  0x1c   : > { %171 = vst [vmem:[#allocation0] sm:$0xf] %v170_v13 }
  0x1d   : > { %175 = vst [vmem:[#allocation4] sm:$0xf] %v174_v14 }
  0x21   : > { %v179_v3 = vld [vmem:[#allocation2] ss:$0 sm:$0xff] }
  0x22   : > { %v180_v4 = vld [vmem:[#allocation6] ss:$0 sm:$0xff]  ;;  %v186_v6 = vmul.f32 %v179_v3, %v179_v3  ;;  %v220_v7 = vmul.f32 0.0, %v179_v3 }
  0x23   : > { %v183_v5 = vxor.u32 2147483648, %v180_v4  ;;  %v181_v15 = vld [vmem:[#allocation0] ss:$0 sm:$0xff]  ;;  %v251_v51 = vld [vmem:[#allocation0 + $0x1] ss:$0 sm:$0xff] }
  0x24   : > { %v841_v22 = vld [vmem:[#allocation4] sm:$0xff] }
  0x25   : > { %v187_v8 = vmul.f32 %v183_v5, %v180_v4  ;;  %v219_v9 = vmul.f32 0.0, %v183_v5  ;;  %v843_v24 = vld [vmem:[#allocation0] sm:$0xff] }
  0x27   : > { %v188_v10 = vsub.f32 %v186_v6, %v187_v8  ;;  %v221_v11 = vadd.f32 %v220_v7, %v219_v9  ;;  %v218_v12 = vsub.f32 %v220_v7, %v219_v9 }
  0x29   : > { %193 = vadd.xlane.f32.xlu0 %v188_v10  ;;  %225 = vadd.xlane.f32.xlu1 %v221_v11 }
  0x31   : > { %223 = vadd.xlane.f32.xlu0 %v218_v12 }
  0x9c   : > { %v194_v16 = vpop.xlane.xlu0 %193  ;;  %v226_v21 = vpop.xlane.xlu1 %225 }
  0x9d   : > { %v197_v17 = vsub.f32 %v181_v15, %v194_v16  ;;  %v228_v26 = vsub.f32 %v841_v22, %v226_v21 }
  0x9f   : > { %721 = vrsqrt.f32 %v197_v17  ;;  %vm205_vm1 = vweird.f32 %v197_v17  ;;  %v232_v30 = vmul.f32 0.0, %v228_v26 }
  0xa4   : > { %v224_v23 = vpop.xlane.xlu0 %223 }
  0xa5   : > { %v722_v18 = vpop.eup %721  ;;  %v227_v27 = vsub.f32 %v843_v24, %v224_v23 }
  0xa6   : > { %v200_v19 = vmul.f32 %v722_v18, %v197_v17  ;;  %vm206_vm0 = vweird.f32 %v722_v18 }
  0xa7   : > { %vm207_vm2 = vmor %vm205_vm1, %vm206_vm0  ;;  %v234_v31 = vmul.f32 0.0, %v227_v27 }
  0xa8   : > { %v201_v20 = vmul.f32 %v722_v18, %v200_v19 }
  0xaa   : > { %v202_v25 = vmul.f32 0.5, %v201_v20 }
  0xac   : > { %v203_v28 = vsub.f32 1.5, %v202_v25  ;;  %v323_v25 = vld [vmem:[#allocation0 + $0x2] ss:$0 sm:$0xff] }
  0xae   : > { %v204_v29 = vmul.f32 %v722_v18, %v203_v28 }
  0xb0   : > { %v208_v32 = vsel %vm207_vm2, %v722_v18, %v204_v29  ;;  %vm388_vm2 = vcmask 31768  }
  0xb1   : > { %v235_v33 = vmul.f32 %v228_v26, %v208_v32  ;;  %v231_v34 = vmul.f32 %v227_v27, %v208_v32 }
  0xb3   : > { %v233_v35 = vsub.f32 %v231_v34, %v232_v30  ;;  %v236_v36 = vadd.f32 %v235_v33, %v234_v31 }
  0xb5   : > { %v238_v37 = vsel %vm178_vm3, %v233_v35, 0.0  ;;  %v239_v38 = vsel %vm178_vm3, %v236_v36, 0.0  ;;  %vm452_vm3 = vcmask 1047555  }
  0xb6   : > { %242 = vst [vmem:[#allocation2] sm:$0xff] %v238_v37 }
  0xb7   : > { %243 = vst [vmem:[#allocation6] sm:$0xff] %v239_v38 }
  0xbd   : > { %v247_v39 = vld [vmem:[#allocation2 + $0x1] ss:$0 sm:$0xff] }
  0xbe   : > { %v248_v40 = vld [vmem:[#allocation6 + $0x1] ss:$0 sm:$0xff]  ;;  %v286_v42 = vmul.f32 %v247_v39, %v238_v37  ;;  %v256_v44 = vmul.f32 %v247_v39, %v247_v39  ;;  %v290_v49 = vmul.f32 %v247_v39, %v239_v38 }
  0xbf   : > { %v253_v41 = vxor.u32 2147483648, %v248_v40 }
  0xc1   : > { %v287_v43 = vmul.f32 %v253_v41, %v239_v38  ;;  %v257_v45 = vmul.f32 %v253_v41, %v248_v40  ;;  %v289_v48 = vmul.f32 %v253_v41, %v238_v37 }
  0xc3   : > { %v288_v46 = vsub.f32 %v286_v42, %v287_v43  ;;  %v258_v47 = vsub.f32 %v256_v44, %v257_v45  ;;  %v291_v50 = vadd.f32 %v290_v49, %v289_v48 }
  0xc5   : > { %293 = vadd.xlane.f32.xlu2 %v288_v46  ;;  %263 = vadd.xlane.f32.xlu1 %v258_v47 }
  0xcd   : > { %295 = vadd.xlane.f32.xlu2 %v291_v50 }
 0x138   : > { %v264_v52 = vpop.xlane.xlu1 %263  ;;  %v294_v54 = vpop.xlane.xlu2 %293 }
 0x139   : > { %v267_v53 = vsub.f32 %v251_v51, %v264_v52  ;;  %v297_v61 = vsub.f32 %v843_v24, %v294_v54 }
 0x13b   : > { %723 = vrsqrt.f32 %v267_v53  ;;  %vm275_vm5 = vweird.f32 %v267_v53  ;;  %v304_v1 = vmul.f32 0.0, %v297_v61 }
 0x140   : > { %v296_v59 = vpop.xlane.xlu2 %295 }
 0x141   : > { %v724_v55 = vpop.eup %723  ;;  %v298_v62 = vsub.f32 %v841_v22, %v296_v59 }
 0x142   : > { %v270_v56 = vmul.f32 %v724_v55, %v267_v53  ;;  %vm276_vm4 = vweird.f32 %v724_v55 }
 0x143   : > { %vm277_vm8 = vmor %vm275_vm5, %vm276_vm4  ;;  %v302_v3 = vmul.f32 0.0, %v298_v62 }
 0x144   : > { %v271_v57 = vmul.f32 %v724_v55, %v270_v56  ;;  %vm453_vm5 = vmand %vm388_vm2, %vm452_vm3 }
 0x146   : > { %v272_v58 = vmul.f32 0.5, %v271_v57 }
 0x148   : > { %v273_v60 = vsub.f32 1.5, %v272_v58 }
 0x14a   : > { %v274_v63 = vmul.f32 %v724_v55, %v273_v60 }
 0x14c   : > { %v278_v0 = vsel %vm277_vm8, %v724_v55, %v274_v63 }
 0x14d   : > { %v301_v2 = vmul.f32 %v297_v61, %v278_v0  ;;  %v305_v4 = vmul.f32 %v298_v62, %v278_v0  ;;  %v395_v61 = vld [vmem:[#allocation0 + $0x3] ss:$0 sm:$0xff] }
 0x14f   : > { %v303_v5 = vsub.f32 %v301_v2, %v302_v3  ;;  %v306_v6 = vadd.f32 %v305_v4, %v304_v1 }
 0x151   : > { %v310_v7 = vsel %vm309_vm9, %v303_v5, 0.0  ;;  %v311_v8 = vsel %vm309_vm9, %v306_v6, 0.0 }
 0x152   : > { %v312_v9 = vadd.f32 %v310_v7, %v238_v37  ;;  %v313_v10 = vadd.f32 %v311_v8, %v239_v38 }
 0x154   : > { %314 = vst [vmem:[#allocation2] sm:$0xff] %v312_v9 }
 0x155   : > { %315 = vst [vmem:[#allocation6] sm:$0xff] %v313_v10 }
 0x15b   : > { %v319_v11 = vld [vmem:[#allocation2 + $0x2] ss:$0 sm:$0xff] }
 0x15c   : > { %v320_v12 = vld [vmem:[#allocation6 + $0x2] ss:$0 sm:$0xff]  ;;  %v362_v14 = vmul.f32 %v319_v11, %v313_v10  ;;  %v358_v15 = vmul.f32 %v319_v11, %v312_v9  ;;  %v328_v18 = vmul.f32 %v319_v11, %v319_v11 }
 0x15d   : > { %v325_v13 = vxor.u32 2147483648, %v320_v12 }
 0x15f   : > { %v361_v16 = vmul.f32 %v325_v13, %v312_v9  ;;  %v359_v17 = vmul.f32 %v325_v13, %v313_v10  ;;  %v329_v19 = vmul.f32 %v325_v13, %v320_v12 }
 0x161   : > { %v363_v20 = vadd.f32 %v362_v14, %v361_v16  ;;  %v360_v21 = vsub.f32 %v358_v15, %v359_v17  ;;  %v330_v23 = vsub.f32 %v328_v18, %v329_v19 }
 0x163   : > { %367 = vadd.xlane.f32.xlu2 %v363_v20  ;;  %365 = vadd.xlane.f32.xlu1 %v360_v21 }
 0x164   : > { %335 = vadd.xlane.f32.xlu0 %v330_v23 }
 0x1d6   : > { %v368_v31 = vpop.xlane.xlu2 %367  ;;  %v366_v32 = vpop.xlane.xlu1 %365 }
 0x1d7   : > { %v336_v26 = vpop.xlane.xlu0 %335  ;;  %v370_v35 = vsub.f32 %v841_v22, %v368_v31  ;;  %v369_v36 = vsub.f32 %v843_v24, %v366_v32 }
 0x1d8   : > { %v339_v27 = vsub.f32 %v323_v25, %v336_v26 }
 0x1d9   : > { %v374_v39 = vmul.f32 0.0, %v370_v35  ;;  %v376_v40 = vmul.f32 0.0, %v369_v36 }
 0x1da   : > { %725 = vrsqrt.f32 %v339_v27  ;;  %vm347_vm11 = vweird.f32 %v339_v27 }
 0x1e0   : > { %v726_v28 = vpop.eup %725 }
 0x1e1   : > { %v342_v29 = vmul.f32 %v726_v28, %v339_v27  ;;  %vm348_vm10 = vweird.f32 %v726_v28 }
 0x1e2   : > { %vm349_vm14 = vmor %vm347_vm11, %vm348_vm10 }
 0x1e3   : > { %v343_v30 = vmul.f32 %v726_v28, %v342_v29 }
 0x1e5   : > { %v344_v33 = vmul.f32 0.5, %v343_v30 }
 0x1e7   : > { %v345_v34 = vsub.f32 1.5, %v344_v33 }
 0x1e9   : > { %v346_v37 = vmul.f32 %v726_v28, %v345_v34 }
 0x1eb   : > { %v350_v38 = vsel %vm349_vm14, %v726_v28, %v346_v37 }
 0x1ec   : > { %v373_v41 = vmul.f32 %v369_v36, %v350_v38  ;;  %v377_v42 = vmul.f32 %v370_v35, %v350_v38 }
 0x1ee   : > { %v375_v43 = vsub.f32 %v373_v41, %v374_v39  ;;  %v378_v44 = vadd.f32 %v377_v42, %v376_v40 }
 0x1f0   : > { %v382_v45 = vsel %vm381_vm15, %v375_v43, 0.0  ;;  %v383_v46 = vsel %vm381_vm15, %v378_v44, 0.0 }
 0x1f1   : > { %v384_v47 = vadd.f32 %v382_v45, %v312_v9  ;;  %v385_v48 = vadd.f32 %v383_v46, %v313_v10 }
 0x1f3   : > { %386 = vst [vmem:[#allocation2] sm:$0xff] %v384_v47 }
 0x1f4   : > { %387 = vst [vmem:[#allocation6] sm:$0xff] %v385_v48 }
 0x1fa   : > { %v391_v49 = vld [vmem:[#allocation2 + $0x3] ss:$0 sm:$0xff] }
 0x1fb   : > { %v392_v50 = vld [vmem:[#allocation6 + $0x3] ss:$0 sm:$0xff]  ;;  %v434_v52 = vmul.f32 %v391_v49, %v385_v48  ;;  %v430_v53 = vmul.f32 %v391_v49, %v384_v47  ;;  %v400_v56 = vmul.f32 %v391_v49, %v391_v49 }
 0x1fc   : > { %v397_v51 = vxor.u32 2147483648, %v392_v50 }
 0x1fe   : > { %v433_v54 = vmul.f32 %v397_v51, %v384_v47  ;;  %v431_v55 = vmul.f32 %v397_v51, %v385_v48  ;;  %v401_v57 = vmul.f32 %v397_v51, %v392_v50 }
 0x200   : > { %v435_v58 = vadd.f32 %v434_v52, %v433_v54  ;;  %v432_v59 = vsub.f32 %v430_v53, %v431_v55  ;;  %v402_v60 = vsub.f32 %v400_v56, %v401_v57 }
 0x202   : > { %439 = vadd.xlane.f32.xlu2 %v435_v58  ;;  %437 = vadd.xlane.f32.xlu1 %v432_v59 }
 0x203   : > { %407 = vadd.xlane.f32.xlu0 %v402_v60 }
 0x275   : > { %v440_v3 = vpop.xlane.xlu2 %439  ;;  %v438_v4 = vpop.xlane.xlu1 %437 }
 0x276   : > { %v408_v62 = vpop.xlane.xlu0 %407  ;;  %v442_v7 = vsub.f32 %v841_v22, %v440_v3  ;;  %v441_v8 = vsub.f32 %v843_v24, %v438_v4 }
 0x277   : > { %v411_v63 = vsub.f32 %v395_v61, %v408_v62 }
 0x278   : > { %v446_v11 = vmul.f32 0.0, %v442_v7  ;;  %v448_v12 = vmul.f32 0.0, %v441_v8 }
 0x279   : > { %727 = vrsqrt.f32 %v411_v63  ;;  %vm419_vm1 = vweird.f32 %v411_v63 }
 0x27f   : > { %v728_v0 = vpop.eup %727 }
 0x280   : > { %v414_v1 = vmul.f32 %v728_v0, %v411_v63  ;;  %vm420_vm0 = vweird.f32 %v728_v0 }
 0x281   : > { %vm421_vm4 = vmor %vm419_vm1, %vm420_vm0 }
 0x282   : > { %v415_v2 = vmul.f32 %v728_v0, %v414_v1 }
 0x284   : > { %v416_v5 = vmul.f32 0.5, %v415_v2 }
 0x286   : > { %v417_v6 = vsub.f32 1.5, %v416_v5 }
 0x288   : > { %v418_v9 = vmul.f32 %v728_v0, %v417_v6 }
 0x28a   : > { %v422_v10 = vsel %vm421_vm4, %v728_v0, %v418_v9 }
 0x28b   : > { %v445_v13 = vmul.f32 %v441_v8, %v422_v10  ;;  %v449_v14 = vmul.f32 %v442_v7, %v422_v10 }
 0x28d   : > { %v447_v15 = vsub.f32 %v445_v13, %v446_v11  ;;  %v450_v16 = vadd.f32 %v449_v14, %v448_v12 }
 0x28f   : > { %v454_v22 = vsel %vm453_vm5, %v447_v15, 0.0  ;;  %v455_v17 = vsel %vm453_vm5, %v450_v16, 0.0 }
 0x290   : > { %v456_v24 = vadd.f32 %v454_v22, %v384_v47  ;;  %v457_v18 = vadd.f32 %v455_v17, %v385_v48 }
 0x292   : > { %458 = vst [vmem:[#allocation2] sm:$0xff] %v456_v24 }
 0x293   : > { %459 = vst [vmem:[#allocation6] sm:$0xff] %v457_v18 }
 0x299   : > { %v462_v19 = vld [vmem:[#allocation2] sm:$0xf] }
 0x29a   : > { %465 = vst [vmem:[%s163_s17] sm:$0xf] %v462_v19  ;;  %v468_v20 = vld [vmem:[#allocation6] sm:$0xf] }
 0x29b   : > { %471 = vst [vmem:[%s167_s20] sm:$0xf] %v468_v20 }
 0x2a1   : > { %v502_v21 = vld [vmem:[%s163_s17] sm:$0xf] }
 0x2a2   : > { %503 = vst [vmem:[%s485_s24] sm:$0xf] %v502_v21  ;;  %v541_v23 = vld [vmem:[%s167_s20] sm:$0xf] }
 0x2a3   : > { %542 = vst [vmem:[%s524_s27] sm:$0xf] %v541_v23 }
 0x2a4 PF: > { %s10_s16 = sadd.s32 1, %s767_s16   ;;  %s882_s12 = smov %s759_s14 }
 0x2a5   : > { %p7_p6 = scmp.ge.s32.totalorder %s10_s16, 34   ;;  %s883_s13 = smov %s763_s15 }
 0x2a6   : > { %s884_s14 = smov %s887_s18  ;;  %s885_s15 = smov %s891_s19 }
 0x2a7   :  { %9 = sbr.rel (!%p7_p6) target bundleno = 3 (0x3), region = 198 }

// kernel: custom-call.24
= control target key start
LH: loop header
LB: loop body
LE: loop exit
PB: predicated region body
PF: predicated region fallthrough
CT: control target
= control target key end

     0   :  { %s765_s12 = smov 0   ;;  %s767_s13 = smov 0   ;;  %s916_s0 = inlined_call_operand.vmem [shape: f32[2,16,1,4,4], index: 0, kind: input, shape index: {}]   ;;  %s917_s1 = inlined_call_operand.vmem [shape: f32[2,16,1,4,4], index: 1, kind: input, shape index: {}]   ;;  %s918_s2 = inlined_call_operand.vmem [shape: f32[2,16,1,4,4], index: 2, kind: output, shape index: {0}]   ;;  %s919_s3 = inlined_call_operand.vmem [shape: f32[2,16,1,4,4], index: 3, kind: output, shape index: {1}]  }
   0x1   :  { %s769_s14 = smov 0   ;;  %s771_s15 = smov 0  }
   0x2   :  { %s773_s16 = smov 0  }
   0x3 LB: > { %s637_s17 = sadd.s32 4294967295, %s742_s16   ;;  %s39_s18 = sadd.s32 1, %s734_s14  ;;  %s742_s16 = sphi %s773_s16, %s10_s16   ;;  %s738_s15 = sphi %s771_s15, %s927_s15   ;;  %s734_s14 = sphi %s769_s14, %s926_s14   ;;  %s730_s13 = sphi %s767_s13, %s925_s13   ;;  %s726_s12 = sphi %s765_s12, %s924_s12  }
   0x4   : > { %p41_p0 = scmp.ge.s32.totalorder %s39_s18, 16  ;;  %s43_s19 = sadd.s32 1, %s738_s15 }
   0x5   : > { %p639_p2 = scmp.ge.s32.totalorder %s742_s16, 32 }
   0x6   : > { %s929_s18 = smov (%p41_p0, %s39_s18), 0  ;;  %s931_s19 = smov (!%p41_p0, %s43_s19), %s738_s15 }
   0x7   : > { %p45_p1 = scmp.ge.s32.totalorder %s931_s19, 2  ;;  %57 = sbr.rel (%p639_p2) target bundleno = 16 (0x10), region = 16 }
   0x8   : > { %s59_s20 = sand.u32 (!%p639_p2), 1, %s742_s16   ;;  %s641_s21 = sshll.u32 (!%p639_p2), %s738_s15, 4 }
   0x9   : > { %s933_s19 = smov (%p45_p1, %s931_s19), 0  ;;  %s640_s22 = sshll.u32 (!%p639_p2), %s59_s20, 2 }
   0xa   : > { %s66_s23 = sadd.s32 (!%p639_p2), %s734_s14, %s641_s21  ;;  %s61_s4 = scalar_lea.vmem (!%p639_p2), [#allocation1], %s640_s22 }
   0xb   : > { %s642_s24 = sshll.u32 (!%p639_p2), %s66_s23, 2  ;;  %s105_s5 = scalar_lea.vmem (!%p639_p2), [#allocation3], %s640_s22 }
   0xc   : > { %s68_s27 = scalar_lea.vmem %s916_s0, %s642_s24  ;;  %s112_s30 = scalar_lea.vmem %s917_s1, %s642_s24 }
   0xd   : > { %v85_v0 = vld [vmem:[%s68_s27] sm:$0xf] }
   0xe   : > { %86 = vst [vmem:[%s61_s4] sm:$0xf] %v85_v0  ;;  %v129_v1 = vld [vmem:[%s112_s30] sm:$0xf] }
   0xf   : > { %130 = vst [vmem:[%s105_s5] sm:$0xf] %v129_v1 }
  0x10 PF: > { %p646_p3 = scmp.ge.s32.totalorder %s742_s16, 1  ;;  %p147_p4 = scmp.lt.s32.totalorder %s742_s16, 33 }
  0x12   : > { %p148_p5 = pnand %p646_p3, %p147_p4 }
  0x14   : > { %151 = sbr.rel (%p148_p5) target bundleno = 627 (0x273), region = 80 }
  0x19   : > { %s162_s6 = sand.u32 1, %s637_s17   ;;  %v185_v2 = vlaneseq  ;;  %v744_v1 = vmov -1.0   ;;  %s653_s10 = sshll.u32 %s730_s13, 4 }
  0x1a   : > { %s810_s7 = sshll.u32 %s162_s6, 2  ;;  %s454_s11 = sadd.s32 %s726_s12, %s653_s10 }
  0x1b   : > { %s164_s8 = scalar_lea.vmem [#allocation1], %s810_s7  ;;  %s168_s9 = scalar_lea.vmem [#allocation3], %s810_s7  ;;  %v814_v5 = vand.u32 127, %v185_v2  ;;  %v816_v6 = vshrl.u32 %v185_v2, 7 }
  0x1c   : > { %v179_v3 = vld [vmem:[%s164_s8] sm:$0xf]  ;;  %v183_v4 = vld [vmem:[%s168_s9] sm:$0xf]  ;;  %s172_s17 = scalar_lea.vmem [#allocation5], %s810_s7  ;;  %s176_s20 = scalar_lea.vmem [#allocation7], %s810_s7 }
  0x1d   : > { %180 = vst [vmem:[#allocation0] sm:$0xf] %v179_v3  ;;  %vm191_vm0 = vcmp.eq.s32.totalorder %v816_v6, %v814_v5  ;;  %vm187_vm2 = vcmp.lt.s32.totalorder %v814_v5, 4  ;;  %vm200_vm3 = vcmp.ge.s32.totalorder %v816_v6, %v814_v5  ;;  %s654_s21 = sshll.u32 %s454_s11, 2 }
  0x1e   : > { %184 = vst [vmem:[#allocation2] sm:$0xf] %v183_v4  ;;  %vm201_vm5 = vmand %vm200_vm3, %vm187_vm2  ;;  %vm281_vm3 = vcmp.eq.s32.totalorder %v814_v5, 0  ;;  %s456_s24 = scalar_lea.vmem %s918_s2, %s654_s21  ;;  %s496_s27 = scalar_lea.vmem %s919_s3, %s654_s21 }
  0x1f   : > { %v282_v2 = vsel %vm281_vm3, 1.0, %v744_v1 }
  0x24   : > { %v192_v7 = vld [vmem:[#allocation0] sm:$0xff] }
  0x25   : > { %v194_v8 = vsel %vm191_vm0, %v192_v7, 0.0  ;;  %v193_v9 = vld [vmem:[#allocation2] sm:$0xff]  ;;  %v202_v26 = vsel %vm201_vm5, %v192_v7, 0.0 }
  0x26   : > { %196 = vadd.xlane.f32.xlu0 %v194_v8  ;;  %v195_v10 = vsel %vm191_vm0, %v193_v9, 0.0  ;;  %v203_v27 = vsel %vm201_vm5, %v193_v9, 0.0  ;;  %v260_v46 = vand.u32 2147483648, %v202_v26  ;;  %vm264_vm10 = vcmp.eq.f32.partialorder %v202_v26, 0.0 }
  0x27   : > { %v262_v47 = vand.u32 2147483648, %v203_v27  ;;  %vm266_vm11 = vcmp.eq.f32.partialorder %v203_v27, 0.0  ;;  %vm292_vm5 = vcmp.eq.s32.totalorder %v814_v5, 1 }
  0x28   : > { %v261_v52 = vor.u32 inf, %v260_v46 }
  0x29   : > { %v263_v53 = vor.u32 inf, %v262_v47 }
  0x2a   : > { %v265_v57 = vsel %vm264_vm10, nan, %v261_v52 }
  0x2b   : > { %v267_v58 = vsel %vm266_vm11, nan, %v263_v53 }
  0x2e   : > { %198 = vadd.xlane.f32.xlu0 %v195_v10 }
  0x99   : > { %v820_v11 = vpop.xlane.xlu0 %196 }
  0x9a   : > { %v206_v13 = vand.u32 2147483647, %v820_v11  ;;  %vm257_vm0 = vcmp.eq.f32.partialorder %v820_v11, 0.0  ;;  %vm423_vm11 = vweird.f32 %v820_v11 }
  0xa1   : > { %v822_v12 = vpop.xlane.xlu0 %198 }
  0xa2   : > { %v207_v14 = vand.u32 2147483647, %v822_v12  ;;  %vm258_vm15 = vcmp.eq.f32.partialorder %v822_v12, 0.0 }
  0xa3   : > { %vm863_vm2 = vmand %vm257_vm0, %vm258_vm15 }
  0xa4   : > { %vm826_vm1 = vcmp.lt.f32.partialorder %v206_v13, %v207_v14 }
  0xa5   : > { %v210_v16 = vsel %vm826_vm1, %v822_v12, %v820_v11  ;;  %v209_v28 = vsel %vm826_vm1, %v820_v11, %v822_v12 }
  0xa6   : > { %700 = vrcp.f32 %v210_v16  ;;  %v222_v20 = vand.u32 2147483648, %v210_v16  ;;  %v220_v22 = vand.u32 2147483647, %v210_v16  ;;  %vm216_vm6 = vweird.f32 %v210_v16 }
  0xa8   : > { %v223_v24 = vor.u32 1.1754944e-38, %v222_v20  ;;  %vm221_vm8 = vcmp.eq.f32.partialorder %v220_v22, 8.507059e+37 }
  0xac   : > { %v701_v17 = vpop.eup %700 }
  0xad   : > { %v212_v18 = vmul.f32 %v701_v17, %v210_v16  ;;  %vm217_vm4 = vweird.f32 %v701_v17 }
  0xae   : > { %vm218_vm7 = vmor %vm216_vm6, %vm217_vm4  ;;  %vm278_vm4 = vcmp.eq.s32.totalorder %v814_v5, %v816_v6  ;;  %vm316_vm6 = vcmp.eq.s32.totalorder %v814_v5, 2 }
  0xaf   : > { %v213_v19 = vsub.f32 1.0, %v212_v18  ;;  %v283_v3 = vsel %vm278_vm4, %v282_v2, 0.0 }
  0xb1   : > { %v214_v21 = vmul.f32 %v701_v17, %v213_v19 }
  0xb3   : > { %v215_v23 = vadd.f32 %v701_v17, %v214_v21 }
  0xb5   : > { %v219_v25 = vsel %vm218_vm7, %v701_v17, %v215_v23  ;;  %vm340_vm7 = vcmp.eq.s32.totalorder %v814_v5, 3 }
  0xb6   : > { %v224_v29 = vsel %vm221_vm8, %v223_v24, %v219_v25  ;;  %vm424_vm8 = vweird.f32 %v822_v12 }
  0xb7   : > { %v841_v30 = vmul.f32 %v224_v29, %v209_v28 }
  0xb9   : > { %v226_v31 = vmul.f32 %v841_v30, %v820_v11  ;;  %v228_v32 = vmul.f32 %v841_v30, %v822_v12  ;;  %v230_v33 = vmul.f32 %v841_v30, %v202_v26  ;;  %v232_v34 = vmul.f32 %v841_v30, %v203_v27 }
  0xbb   : > { %v227_v35 = vadd.f32 %v226_v31, %v822_v12  ;;  %v229_v36 = vadd.f32 %v228_v32, %v820_v11  ;;  %v231_v37 = vadd.f32 %v230_v33, %v203_v27  ;;  %v233_v38 = vadd.f32 %v232_v34, %v202_v26 }
  0xbc   : > { %v252_v39 = vsub.f32 %v232_v34, %v202_v26  ;;  %v254_v40 = vsub.f32 %v203_v27, %v230_v33 }
  0xbd   : > { %v234_v41 = vsel %vm826_vm1, %v231_v37, %v233_v38  ;;  %v235_v42 = vsel %vm826_vm1, %v227_v35, %v229_v36 }
  0xbe   : > { %702 = vrcp.f32 %v235_v42  ;;  %v255_v43 = vsel %vm826_vm1, %v252_v39, %v254_v40  ;;  %v247_v49 = vand.u32 2147483648, %v235_v42  ;;  %v245_v51 = vand.u32 2147483647, %v235_v42 }
  0xbf   : > { %vm241_vm12 = vweird.f32 %v235_v42 }
  0xc0   : > { %v248_v55 = vor.u32 1.1754944e-38, %v247_v49  ;;  %vm246_vm14 = vcmp.eq.f32.partialorder %v245_v51, 8.507059e+37 }
  0xc4   : > { %v703_v44 = vpop.eup %702 }
  0xc5   : > { %v237_v45 = vmul.f32 %v703_v44, %v235_v42  ;;  %vm242_vm9 = vweird.f32 %v703_v44 }
  0xc6   : > { %vm243_vm13 = vmor %vm241_vm12, %vm242_vm9 }
  0xc7   : > { %v238_v48 = vsub.f32 1.0, %v237_v45  ;;  %vm425_vm12 = vmor %vm423_vm11, %vm424_vm8 }
  0xc9   : > { %v239_v50 = vmul.f32 %v703_v44, %v238_v48 }
  0xcb   : > { %v240_v54 = vadd.f32 %v703_v44, %v239_v50 }
  0xcd   : > { %v244_v56 = vsel %vm243_vm13, %v703_v44, %v240_v54 }
  0xce   : > { %v858_v59 = vsel %vm246_vm14, %v248_v55, %v244_v56 }
  0xcf   : > { %v250_v60 = vmul.f32 %v858_v59, %v234_v41  ;;  %v256_v61 = vmul.f32 %v255_v43, %v858_v59 }
  0xd1   : > { %v268_v63 = vsel %vm863_vm2, %v265_v57, %v250_v60  ;;  %v269_v0 = vsel %vm863_vm2, %v267_v58, %v256_v61 }
  0xd2   : > { %271 = vst [vmem:[#allocation8] sm:$0xff] %v268_v63 }
  0xd3   : > { %272 = vst [vmem:[#allocation9] sm:$0xff] %v269_v0 }
  0xd9   : > { %v286_v4 = vld [vmem:[#allocation8 + $0x1] ss:$0 sm:$0xff]  ;;  %v310_v20 = vld [vmem:[#allocation8 + $0x2] ss:$0 sm:$0xff]  ;;  %v334_v34 = vld [vmem:[#allocation8 + $0x3] ss:$0 sm:$0xff] }
  0xda   : > { %v287_v7 = vld [vmem:[#allocation9 + $0x1] ss:$0 sm:$0xff]  ;;  %v288_v8 = vxor.u32 2147483648, %v286_v4  ;;  %v311_v6 = vld [vmem:[#allocation9 + $0x2] ss:$0 sm:$0xff]  ;;  %v312_v22 = vxor.u32 2147483648, %v310_v20 }
  0xdb   : > { %v289_v9 = vxor.u32 2147483648, %v287_v7  ;;  %v313_v24 = vxor.u32 2147483648, %v311_v6  ;;  %v335_v35 = vld [vmem:[#allocation9 + $0x3] ss:$0 sm:$0xff]  ;;  %v336_v38 = vxor.u32 2147483648, %v334_v34 }
  0xdc   : > { %v295_v10 = vmul.f32 %v288_v8, %v283_v3  ;;  %v298_v16 = vmul.f32 0.0, %v288_v8  ;;  %v337_v39 = vxor.u32 2147483648, %v335_v35 }
  0xdd   : > { %v296_v13 = vmul.f32 0.0, %v289_v9  ;;  %v299_v17 = vmul.f32 %v289_v9, %v283_v3 }
  0xdf   : > { %v297_v14 = vsub.f32 %v295_v10, %v296_v13  ;;  %v300_v18 = vadd.f32 %v299_v17, %v298_v16 }
  0xe1   : > { %302 = vadd.xlane.f32.xlu1 %v297_v14 }
  0xe9   : > { %304 = vadd.xlane.f32.xlu1 %v300_v18 }
 0x154   : > { %v303_v19 = vpop.xlane.xlu1 %302 }
 0x155   : > { %v306_v21 = vsel %vm292_vm5, %v303_v19, %v283_v3 }
 0x156   : > { %v319_v26 = vmul.f32 %v312_v22, %v306_v21  ;;  %v323_v31 = vmul.f32 %v313_v24, %v306_v21 }
 0x15c   : > { %v305_v23 = vpop.xlane.xlu1 %304 }
 0x15d   : > { %v307_v25 = vsel %vm292_vm5, %v305_v23, 0.0 }
 0x15e   : > { %v320_v27 = vmul.f32 %v313_v24, %v307_v25  ;;  %v322_v29 = vmul.f32 %v312_v22, %v307_v25 }
 0x160   : > { %v321_v28 = vsub.f32 %v319_v26, %v320_v27  ;;  %v324_v32 = vadd.f32 %v323_v31, %v322_v29 }
 0x162   : > { %326 = vadd.xlane.f32.xlu2 %v321_v28 }
 0x16a   : > { %328 = vadd.xlane.f32.xlu2 %v324_v32 }
 0x1d5   : > { %v327_v33 = vpop.xlane.xlu2 %326 }
 0x1d6   : > { %v330_v36 = vsel %vm316_vm6, %v327_v33, %v306_v21 }
 0x1d7   : > { %v347_v42 = vmul.f32 %v337_v39, %v330_v36  ;;  %v343_v43 = vmul.f32 %v336_v38, %v330_v36 }
 0x1dd   : > { %v329_v37 = vpop.xlane.xlu2 %328 }
 0x1de   : > { %v331_v40 = vsel %vm316_vm6, %v329_v37, %v307_v25 }
 0x1df   : > { %v346_v41 = vmul.f32 %v336_v38, %v331_v40  ;;  %v344_v44 = vmul.f32 %v337_v39, %v331_v40 }
 0x1e1   : > { %v348_v45 = vadd.f32 %v347_v42, %v346_v41  ;;  %v345_v46 = vsub.f32 %v343_v43, %v344_v44 }
 0x1e3   : > { %352 = vadd.xlane.f32.xlu1 %v348_v45  ;;  %350 = vadd.xlane.f32.xlu0 %v345_v46 }
 0x256   : > { %v353_v47 = vpop.xlane.xlu1 %352  ;;  %v351_v48 = vpop.xlane.xlu0 %350 }
 0x257   : > { %v355_v49 = vsel %vm340_vm7, %v353_v47, %v331_v40  ;;  %v354_v50 = vsel %vm340_vm7, %v351_v48, %v330_v36 }
 0x258   : > { %v384_v51 = vmul.f32 %v355_v49, %v841_v30  ;;  %v414_v52 = vand.u32 2147483648, %v355_v49  ;;  %v382_v53 = vmul.f32 %v354_v50, %v841_v30  ;;  %v412_v54 = vand.u32 2147483648, %v354_v50 }
 0x259   : > { %vm416_vm9 = vcmp.eq.f32.partialorder %v354_v50, 0.0  ;;  %vm418_vm10 = vcmp.eq.f32.partialorder %v355_v49, 0.0 }
 0x25a   : > { %v383_v55 = vadd.f32 %v382_v53, %v355_v49  ;;  %v385_v56 = vadd.f32 %v384_v51, %v354_v50  ;;  %v404_v57 = vsub.f32 %v384_v51, %v354_v50  ;;  %v415_v58 = vor.u32 inf, %v414_v52 }
 0x25b   : > { %v406_v60 = vsub.f32 %v355_v49, %v382_v53  ;;  %v413_v61 = vor.u32 inf, %v412_v54 }
 0x25c   : > { %v386_v5 = vsel %vm826_vm1, %v383_v55, %v385_v56  ;;  %v419_v12 = vsel %vm418_vm10, nan, %v415_v58 }
 0x25d   : > { %v402_v63 = vmul.f32 %v386_v5, %v858_v59  ;;  %v407_v0 = vsel %vm826_vm1, %v404_v57, %v406_v60  ;;  %v417_v1 = vsel %vm416_vm9, nan, %v413_v61 }
 0x25e   : > { %v408_v30 = vmul.f32 %v407_v0, %v858_v59 }
 0x25f   : > { %v420_v2 = vsel %vm863_vm2, %v417_v1, %v402_v63 }
 0x260   : > { %v421_v3 = vsel %vm863_vm2, %v419_v12, %v408_v30  ;;  %v426_v15 = vsel %vm425_vm12, %v354_v50, %v420_v2 }
 0x261   : > { %v427_v4 = vsel %vm425_vm12, %v355_v49, %v421_v3  ;;  %428 = vst [vmem:[#allocation4] sm:$0xff] %v426_v15 }
 0x262   : > { %429 = vst [vmem:[#allocation6] sm:$0xff] %v427_v4 }
 0x268   : > { %v432_v7 = vld [vmem:[#allocation4] sm:$0xf] }
 0x269   : > { %435 = vst [vmem:[%s172_s17] sm:$0xf] %v432_v7  ;;  %v438_v11 = vld [vmem:[#allocation6] sm:$0xf] }
 0x26a   : > { %441 = vst [vmem:[%s176_s20] sm:$0xf] %v438_v11 }
 0x270   : > { %v473_v59 = vld [vmem:[%s172_s17] sm:$0xf] }
 0x271   : > { %474 = vst [vmem:[%s456_s24] sm:$0xf] %v473_v59  ;;  %v513_v62 = vld [vmem:[%s176_s20] sm:$0xf] }
 0x272   : > { %514 = vst [vmem:[%s496_s27] sm:$0xf] %v513_v62 }
 0x273 PF: > { %s10_s16 = sadd.s32 1, %s742_s16   ;;  %s924_s12 = smov %s734_s14 }
 0x274   : > { %p7_p6 = scmp.ge.s32.totalorder %s10_s16, 34   ;;  %s925_s13 = smov %s738_s15 }
 0x275   : > { %s926_s14 = smov %s929_s18  ;;  %s927_s15 = smov %s933_s19 }
 0x276   :  { %9 = sbr.rel (!%p7_p6) target bundleno = 3 (0x3), region = 192 }

// kernel: custom-call.2
= control target key start
LH: loop header
LB: loop body
LE: loop exit
PB: predicated region body
PF: predicated region fallthrough
CT: control target
= control target key end

     0   :  { %2 = vsyncpa [#allocation0], 0  ;;  %s55_s0 = inlined_call_operand.hbm [shape: c64[2,4,4,16], index: 0, kind: input, shape index: {}]   ;;  %s56_s1 = inlined_call_operand.vmem [shape: f32[2,4,4,16], index: 1, kind: output, shape index: {}]  }
   0x1   :  { %s4_s8 = sshll.u32 %s55_s0, 4  ;;  %s6_s11 = sshll.u32 %s56_s1, 4  ;;  %s5_s8 = int_to_ptr.hbm [resolvable:$true] %s4_s8  ;;  %s7_s11 = int_to_ptr.vmem [resolvable:$true] %s6_s11 }
   0x2   :  { %9 = dma.hbm_to_vmem [thread:$0]  %s5_s8, 512, %s7_s11, [#allocation0] }
   0x3   :  { %37 = dma.done.wait [#allocation0], 512  }
   0x4   :  { %38 = vsyncadd [#allocation0], 4294966784 }
   0x5   :  { %12 = vsyncpa [#allocation0], 1 }

// kernel: custom-call.3
= control target key start
LH: loop header
LB: loop body
LE: loop exit
PB: predicated region body
PF: predicated region fallthrough
CT: control target
= control target key end

     0   :  { %s56_s0 = inlined_call_operand.hbm [shape: c64[2,4,4,16], index: 0, kind: input, shape index: {}]   ;;  %s57_s1 = inlined_call_operand.vmem [shape: f32[2,4,4,16], index: 1, kind: output, shape index: {}]  }
   0x1   :  { %s2_s8 = scalar_lea.hbm %s56_s0, 32 }
   0x2   :  { %3 = vsyncpa [#allocation0], 0  ;;  %s5_s9 = sshll.u32 %s2_s8, 4  ;;  %s7_s12 = sshll.u32 %s57_s1, 4  ;;  %s6_s9 = int_to_ptr.hbm [resolvable:$true] %s5_s9  ;;  %s8_s12 = int_to_ptr.vmem [resolvable:$true] %s7_s12 }
   0x3   :  { %10 = dma.hbm_to_vmem [thread:$0]  %s6_s9, 512, %s8_s12, [#allocation0] }
   0x4   :  { %38 = dma.done.wait [#allocation0], 512  }
   0x5   :  { %39 = vsyncadd [#allocation0], 4294966784 }
   0x6   :  { %13 = vsyncpa [#allocation0], 1 }

// kernel: custom-call.14
= control target key start
LH: loop header
LB: loop body
LE: loop exit
PB: predicated region body
PF: predicated region fallthrough
CT: control target
= control target key end

     0   :  { %s763_s12 = smov 0   ;;  %s765_s13 = smov 0   ;;  %s914_s0 = inlined_call_operand.vmem [shape: f32[2,16,1,4,4], index: 0, kind: input, shape index: {}]   ;;  %s915_s1 = inlined_call_operand.vmem [shape: f32[2,16,1,4,4], index: 1, kind: input, shape index: {}]   ;;  %s916_s2 = inlined_call_operand.vmem [shape: f32[2,16,1,4,4], index: 2, kind: output, shape index: {0}]   ;;  %s917_s3 = inlined_call_operand.vmem [shape: f32[2,16,1,4,4], index: 3, kind: output, shape index: {1}]  }
   0x1   :  { %s767_s14 = smov 0   ;;  %s769_s15 = smov 0  }
   0x2   :  { %s771_s16 = smov 0  }
   0x3 LB: > { %s635_s17 = sadd.s32 4294967295, %s740_s16   ;;  %s39_s18 = sadd.s32 1, %s732_s14  ;;  %s740_s16 = sphi %s771_s16, %s10_s16   ;;  %s736_s15 = sphi %s769_s15, %s925_s15   ;;  %s732_s14 = sphi %s767_s14, %s924_s14   ;;  %s728_s13 = sphi %s765_s13, %s923_s13   ;;  %s724_s12 = sphi %s763_s12, %s922_s12  }
   0x4   : > { %p41_p0 = scmp.ge.s32.totalorder %s39_s18, 16  ;;  %s43_s19 = sadd.s32 1, %s736_s15 }
   0x5   : > { %p637_p2 = scmp.ge.s32.totalorder %s740_s16, 32 }
   0x6   : > { %s927_s18 = smov (%p41_p0, %s39_s18), 0  ;;  %s929_s19 = smov (!%p41_p0, %s43_s19), %s736_s15 }
   0x7   : > { %p45_p1 = scmp.ge.s32.totalorder %s929_s19, 2  ;;  %57 = sbr.rel (%p637_p2) target bundleno = 16 (0x10), region = 16 }
   0x8   : > { %s59_s20 = sand.u32 (!%p637_p2), 1, %s740_s16   ;;  %s639_s21 = sshll.u32 (!%p637_p2), %s736_s15, 4 }
   0x9   : > { %s931_s19 = smov (%p45_p1, %s929_s19), 0  ;;  %s638_s22 = sshll.u32 (!%p637_p2), %s59_s20, 2 }
   0xa   : > { %s66_s23 = sadd.s32 (!%p637_p2), %s732_s14, %s639_s21  ;;  %s61_s4 = scalar_lea.vmem (!%p637_p2), [#allocation1], %s638_s22 }
   0xb   : > { %s640_s24 = sshll.u32 (!%p637_p2), %s66_s23, 2  ;;  %s105_s5 = scalar_lea.vmem (!%p637_p2), [#allocation3], %s638_s22 }
   0xc   : > { %s68_s27 = scalar_lea.vmem %s914_s0, %s640_s24  ;;  %s112_s30 = scalar_lea.vmem %s915_s1, %s640_s24 }
   0xd   : > { %v85_v0 = vld [vmem:[%s68_s27] sm:$0xf] }
   0xe   : > { %86 = vst [vmem:[%s61_s4] sm:$0xf] %v85_v0  ;;  %v129_v1 = vld [vmem:[%s112_s30] sm:$0xf] }
   0xf   : > { %130 = vst [vmem:[%s105_s5] sm:$0xf] %v129_v1 }
  0x10 PF: > { %p644_p3 = scmp.ge.s32.totalorder %s740_s16, 1  ;;  %p147_p4 = scmp.lt.s32.totalorder %s740_s16, 33 }
  0x12   : > { %p148_p5 = pnand %p644_p3, %p147_p4 }
  0x14   : > { %151 = sbr.rel (%p148_p5) target bundleno = 627 (0x273), region = 80 }
  0x19   : > { %s162_s6 = sand.u32 1, %s635_s17   ;;  %v185_v2 = vlaneseq  ;;  %v742_v1 = vmov -1.0   ;;  %s651_s10 = sshll.u32 %s728_s13, 4 }
  0x1a   : > { %s808_s7 = sshll.u32 %s162_s6, 2  ;;  %s452_s11 = sadd.s32 %s724_s12, %s651_s10 }
  0x1b   : > { %s164_s8 = scalar_lea.vmem [#allocation1], %s808_s7  ;;  %s168_s9 = scalar_lea.vmem [#allocation3], %s808_s7  ;;  %v812_v5 = vand.u32 127, %v185_v2  ;;  %v814_v6 = vshrl.u32 %v185_v2, 7 }
  0x1c   : > { %v179_v3 = vld [vmem:[%s164_s8] sm:$0xf]  ;;  %v183_v4 = vld [vmem:[%s168_s9] sm:$0xf]  ;;  %s172_s17 = scalar_lea.vmem [#allocation5], %s808_s7  ;;  %s176_s20 = scalar_lea.vmem [#allocation7], %s808_s7 }
  0x1d   : > { %180 = vst [vmem:[#allocation0] sm:$0xf] %v179_v3  ;;  %vm191_vm0 = vcmp.eq.s32.totalorder %v814_v6, %v812_v5  ;;  %vm187_vm2 = vcmp.lt.s32.totalorder %v812_v5, 4  ;;  %vm200_vm3 = vcmp.le.s32.totalorder %v814_v6, %v812_v5  ;;  %s652_s21 = sshll.u32 %s452_s11, 2 }
  0x1e   : > { %184 = vst [vmem:[#allocation2] sm:$0xf] %v183_v4  ;;  %vm201_vm5 = vmand %vm200_vm3, %vm187_vm2  ;;  %vm281_vm3 = vcmp.eq.s32.totalorder %v812_v5, 3  ;;  %s454_s24 = scalar_lea.vmem %s916_s2, %s652_s21  ;;  %s494_s27 = scalar_lea.vmem %s917_s3, %s652_s21 }
  0x1f   : > { %v282_v2 = vsel %vm281_vm3, 1.0, %v742_v1 }
  0x24   : > { %v192_v7 = vld [vmem:[#allocation0] sm:$0xff] }
  0x25   : > { %v194_v8 = vsel %vm191_vm0, %v192_v7, 0.0  ;;  %v193_v9 = vld [vmem:[#allocation2] sm:$0xff]  ;;  %v202_v26 = vsel %vm201_vm5, %v192_v7, 0.0 }
  0x26   : > { %196 = vadd.xlane.f32.xlu0 %v194_v8  ;;  %v195_v10 = vsel %vm191_vm0, %v193_v9, 0.0  ;;  %v203_v27 = vsel %vm201_vm5, %v193_v9, 0.0  ;;  %v260_v46 = vand.u32 2147483648, %v202_v26  ;;  %vm264_vm10 = vcmp.eq.f32.partialorder %v202_v26, 0.0 }
  0x27   : > { %v262_v47 = vand.u32 2147483648, %v203_v27  ;;  %vm266_vm11 = vcmp.eq.f32.partialorder %v203_v27, 0.0  ;;  %vm292_vm5 = vcmp.eq.s32.totalorder %v812_v5, 2 }
  0x28   : > { %v261_v52 = vor.u32 inf, %v260_v46 }
  0x29   : > { %v263_v53 = vor.u32 inf, %v262_v47 }
  0x2a   : > { %v265_v57 = vsel %vm264_vm10, nan, %v261_v52 }
  0x2b   : > { %v267_v58 = vsel %vm266_vm11, nan, %v263_v53 }
  0x2e   : > { %198 = vadd.xlane.f32.xlu0 %v195_v10 }
  0x99   : > { %v818_v11 = vpop.xlane.xlu0 %196 }
  0x9a   : > { %v206_v13 = vand.u32 2147483647, %v818_v11  ;;  %vm257_vm0 = vcmp.eq.f32.partialorder %v818_v11, 0.0  ;;  %vm421_vm11 = vweird.f32 %v818_v11 }
  0xa1   : > { %v820_v12 = vpop.xlane.xlu0 %198 }
  0xa2   : > { %v207_v14 = vand.u32 2147483647, %v820_v12  ;;  %vm258_vm15 = vcmp.eq.f32.partialorder %v820_v12, 0.0 }
  0xa3   : > { %vm861_vm2 = vmand %vm257_vm0, %vm258_vm15 }
  0xa4   : > { %vm824_vm1 = vcmp.lt.f32.partialorder %v206_v13, %v207_v14 }
  0xa5   : > { %v210_v16 = vsel %vm824_vm1, %v820_v12, %v818_v11  ;;  %v209_v28 = vsel %vm824_vm1, %v818_v11, %v820_v12 }
  0xa6   : > { %698 = vrcp.f32 %v210_v16  ;;  %v222_v20 = vand.u32 2147483648, %v210_v16  ;;  %v220_v22 = vand.u32 2147483647, %v210_v16  ;;  %vm216_vm6 = vweird.f32 %v210_v16 }
  0xa8   : > { %v223_v24 = vor.u32 1.1754944e-38, %v222_v20  ;;  %vm221_vm8 = vcmp.eq.f32.partialorder %v220_v22, 8.507059e+37 }
  0xac   : > { %v699_v17 = vpop.eup %698 }
  0xad   : > { %v212_v18 = vmul.f32 %v699_v17, %v210_v16  ;;  %vm217_vm4 = vweird.f32 %v699_v17 }
  0xae   : > { %vm218_vm7 = vmor %vm216_vm6, %vm217_vm4  ;;  %vm278_vm4 = vcmp.eq.s32.totalorder %v812_v5, %v814_v6  ;;  %vm316_vm6 = vcmp.eq.s32.totalorder %v812_v5, 1 }
  0xaf   : > { %v213_v19 = vsub.f32 1.0, %v212_v18  ;;  %v283_v3 = vsel %vm278_vm4, %v282_v2, 0.0 }
  0xb1   : > { %v214_v21 = vmul.f32 %v699_v17, %v213_v19 }
  0xb3   : > { %v215_v23 = vadd.f32 %v699_v17, %v214_v21 }
  0xb5   : > { %v219_v25 = vsel %vm218_vm7, %v699_v17, %v215_v23  ;;  %vm338_vm7 = vcmp.eq.s32.totalorder %v812_v5, 0 }
  0xb6   : > { %v224_v29 = vsel %vm221_vm8, %v223_v24, %v219_v25  ;;  %vm422_vm8 = vweird.f32 %v820_v12 }
  0xb7   : > { %v839_v30 = vmul.f32 %v224_v29, %v209_v28 }
  0xb9   : > { %v226_v31 = vmul.f32 %v839_v30, %v818_v11  ;;  %v228_v32 = vmul.f32 %v839_v30, %v820_v12  ;;  %v230_v33 = vmul.f32 %v839_v30, %v202_v26  ;;  %v232_v34 = vmul.f32 %v839_v30, %v203_v27 }
  0xbb   : > { %v227_v35 = vadd.f32 %v226_v31, %v820_v12  ;;  %v229_v36 = vadd.f32 %v228_v32, %v818_v11  ;;  %v231_v37 = vadd.f32 %v230_v33, %v203_v27  ;;  %v233_v38 = vadd.f32 %v232_v34, %v202_v26 }
  0xbc   : > { %v252_v39 = vsub.f32 %v232_v34, %v202_v26  ;;  %v254_v40 = vsub.f32 %v203_v27, %v230_v33 }
  0xbd   : > { %v234_v41 = vsel %vm824_vm1, %v231_v37, %v233_v38  ;;  %v235_v42 = vsel %vm824_vm1, %v227_v35, %v229_v36 }
  0xbe   : > { %700 = vrcp.f32 %v235_v42  ;;  %v255_v43 = vsel %vm824_vm1, %v252_v39, %v254_v40  ;;  %v247_v49 = vand.u32 2147483648, %v235_v42  ;;  %v245_v51 = vand.u32 2147483647, %v235_v42 }
  0xbf   : > { %vm241_vm12 = vweird.f32 %v235_v42 }
  0xc0   : > { %v248_v55 = vor.u32 1.1754944e-38, %v247_v49  ;;  %vm246_vm14 = vcmp.eq.f32.partialorder %v245_v51, 8.507059e+37 }
  0xc4   : > { %v701_v44 = vpop.eup %700 }
  0xc5   : > { %v237_v45 = vmul.f32 %v701_v44, %v235_v42  ;;  %vm242_vm9 = vweird.f32 %v701_v44 }
  0xc6   : > { %vm243_vm13 = vmor %vm241_vm12, %vm242_vm9 }
  0xc7   : > { %v238_v48 = vsub.f32 1.0, %v237_v45  ;;  %vm423_vm12 = vmor %vm421_vm11, %vm422_vm8 }
  0xc9   : > { %v239_v50 = vmul.f32 %v701_v44, %v238_v48 }
  0xcb   : > { %v240_v54 = vadd.f32 %v701_v44, %v239_v50 }
  0xcd   : > { %v244_v56 = vsel %vm243_vm13, %v701_v44, %v240_v54 }
  0xce   : > { %v856_v59 = vsel %vm246_vm14, %v248_v55, %v244_v56 }
  0xcf   : > { %v250_v60 = vmul.f32 %v856_v59, %v234_v41  ;;  %v256_v61 = vmul.f32 %v255_v43, %v856_v59 }
  0xd1   : > { %v268_v63 = vsel %vm861_vm2, %v265_v57, %v250_v60  ;;  %v269_v0 = vsel %vm861_vm2, %v267_v58, %v256_v61 }
  0xd2   : > { %271 = vst [vmem:[#allocation8] sm:$0xff] %v268_v63 }
  0xd3   : > { %272 = vst [vmem:[#allocation9] sm:$0xff] %v269_v0 }
  0xd9   : > { %v286_v4 = vld [vmem:[#allocation8 + $0x2] ss:$0 sm:$0xff]  ;;  %v310_v20 = vld [vmem:[#allocation8 + $0x1] ss:$0 sm:$0xff]  ;;  %v332_v34 = vld [vmem:[#allocation8] ss:$0 sm:$0xff] }
  0xda   : > { %v287_v7 = vld [vmem:[#allocation9 + $0x2] ss:$0 sm:$0xff]  ;;  %v288_v8 = vxor.u32 2147483648, %v286_v4  ;;  %v311_v6 = vld [vmem:[#allocation9 + $0x1] ss:$0 sm:$0xff]  ;;  %v312_v22 = vxor.u32 2147483648, %v310_v20 }
  0xdb   : > { %v289_v9 = vxor.u32 2147483648, %v287_v7  ;;  %v313_v24 = vxor.u32 2147483648, %v311_v6  ;;  %v333_v35 = vld [vmem:[#allocation9] ss:$0 sm:$0xff]  ;;  %v334_v38 = vxor.u32 2147483648, %v332_v34 }
  0xdc   : > { %v295_v10 = vmul.f32 %v288_v8, %v283_v3  ;;  %v298_v16 = vmul.f32 0.0, %v288_v8  ;;  %v335_v39 = vxor.u32 2147483648, %v333_v35 }
  0xdd   : > { %v296_v13 = vmul.f32 0.0, %v289_v9  ;;  %v299_v17 = vmul.f32 %v289_v9, %v283_v3 }
  0xdf   : > { %v297_v14 = vsub.f32 %v295_v10, %v296_v13  ;;  %v300_v18 = vadd.f32 %v299_v17, %v298_v16 }
  0xe1   : > { %302 = vadd.xlane.f32.xlu1 %v297_v14 }
  0xe9   : > { %304 = vadd.xlane.f32.xlu1 %v300_v18 }
 0x154   : > { %v303_v19 = vpop.xlane.xlu1 %302 }
 0x155   : > { %v306_v21 = vsel %vm292_vm5, %v303_v19, %v283_v3 }
 0x156   : > { %v319_v26 = vmul.f32 %v312_v22, %v306_v21  ;;  %v323_v31 = vmul.f32 %v313_v24, %v306_v21 }
 0x15c   : > { %v305_v23 = vpop.xlane.xlu1 %304 }
 0x15d   : > { %v307_v25 = vsel %vm292_vm5, %v305_v23, 0.0 }
 0x15e   : > { %v320_v27 = vmul.f32 %v313_v24, %v307_v25  ;;  %v322_v29 = vmul.f32 %v312_v22, %v307_v25 }
 0x160   : > { %v321_v28 = vsub.f32 %v319_v26, %v320_v27  ;;  %v324_v32 = vadd.f32 %v323_v31, %v322_v29 }
 0x162   : > { %326 = vadd.xlane.f32.xlu2 %v321_v28 }
 0x16a   : > { %328 = vadd.xlane.f32.xlu2 %v324_v32 }
 0x1d5   : > { %v327_v33 = vpop.xlane.xlu2 %326 }
 0x1d6   : > { %v330_v36 = vsel %vm316_vm6, %v327_v33, %v306_v21 }
 0x1d7   : > { %v345_v42 = vmul.f32 %v335_v39, %v330_v36  ;;  %v341_v43 = vmul.f32 %v334_v38, %v330_v36 }
 0x1dd   : > { %v329_v37 = vpop.xlane.xlu2 %328 }
 0x1de   : > { %v331_v40 = vsel %vm316_vm6, %v329_v37, %v307_v25 }
 0x1df   : > { %v344_v41 = vmul.f32 %v334_v38, %v331_v40  ;;  %v342_v44 = vmul.f32 %v335_v39, %v331_v40 }
 0x1e1   : > { %v346_v45 = vadd.f32 %v345_v42, %v344_v41  ;;  %v343_v46 = vsub.f32 %v341_v43, %v342_v44 }
 0x1e3   : > { %350 = vadd.xlane.f32.xlu1 %v346_v45  ;;  %348 = vadd.xlane.f32.xlu0 %v343_v46 }
 0x256   : > { %v351_v47 = vpop.xlane.xlu1 %350  ;;  %v349_v48 = vpop.xlane.xlu0 %348 }
 0x257   : > { %v353_v49 = vsel %vm338_vm7, %v351_v47, %v331_v40  ;;  %v352_v50 = vsel %vm338_vm7, %v349_v48, %v330_v36 }
 0x258   : > { %v382_v51 = vmul.f32 %v353_v49, %v839_v30  ;;  %v412_v52 = vand.u32 2147483648, %v353_v49  ;;  %v380_v53 = vmul.f32 %v352_v50, %v839_v30  ;;  %v410_v54 = vand.u32 2147483648, %v352_v50 }
 0x259   : > { %vm414_vm9 = vcmp.eq.f32.partialorder %v352_v50, 0.0  ;;  %vm416_vm10 = vcmp.eq.f32.partialorder %v353_v49, 0.0 }
 0x25a   : > { %v381_v55 = vadd.f32 %v380_v53, %v353_v49  ;;  %v383_v56 = vadd.f32 %v382_v51, %v352_v50  ;;  %v402_v57 = vsub.f32 %v382_v51, %v352_v50  ;;  %v413_v58 = vor.u32 inf, %v412_v52 }
 0x25b   : > { %v404_v60 = vsub.f32 %v353_v49, %v380_v53  ;;  %v411_v61 = vor.u32 inf, %v410_v54 }
 0x25c   : > { %v384_v5 = vsel %vm824_vm1, %v381_v55, %v383_v56  ;;  %v417_v12 = vsel %vm416_vm10, nan, %v413_v58 }
 0x25d   : > { %v400_v63 = vmul.f32 %v384_v5, %v856_v59  ;;  %v405_v0 = vsel %vm824_vm1, %v402_v57, %v404_v60  ;;  %v415_v1 = vsel %vm414_vm9, nan, %v411_v61 }
 0x25e   : > { %v406_v30 = vmul.f32 %v405_v0, %v856_v59 }
 0x25f   : > { %v418_v2 = vsel %vm861_vm2, %v415_v1, %v400_v63 }
 0x260   : > { %v419_v3 = vsel %vm861_vm2, %v417_v12, %v406_v30  ;;  %v424_v15 = vsel %vm423_vm12, %v352_v50, %v418_v2 }
 0x261   : > { %v425_v4 = vsel %vm423_vm12, %v353_v49, %v419_v3  ;;  %426 = vst [vmem:[#allocation4] sm:$0xff] %v424_v15 }
 0x262   : > { %427 = vst [vmem:[#allocation6] sm:$0xff] %v425_v4 }
 0x268   : > { %v430_v7 = vld [vmem:[#allocation4] sm:$0xf] }
 0x269   : > { %433 = vst [vmem:[%s172_s17] sm:$0xf] %v430_v7  ;;  %v436_v11 = vld [vmem:[#allocation6] sm:$0xf] }
 0x26a   : > { %439 = vst [vmem:[%s176_s20] sm:$0xf] %v436_v11 }
 0x270   : > { %v471_v59 = vld [vmem:[%s172_s17] sm:$0xf] }
 0x271   : > { %472 = vst [vmem:[%s454_s24] sm:$0xf] %v471_v59  ;;  %v511_v62 = vld [vmem:[%s176_s20] sm:$0xf] }
 0x272   : > { %512 = vst [vmem:[%s494_s27] sm:$0xf] %v511_v62 }
 0x273 PF: > { %s10_s16 = sadd.s32 1, %s740_s16   ;;  %s922_s12 = smov %s732_s14 }
 0x274   : > { %p7_p6 = scmp.ge.s32.totalorder %s10_s16, 34   ;;  %s923_s13 = smov %s736_s15 }
 0x275   : > { %s924_s14 = smov %s927_s18  ;;  %s925_s15 = smov %s931_s19 }
 0x276   :  { %9 = sbr.rel (!%p7_p6) target bundleno = 3 (0x3), region = 190 }

// kernel: custom-call.15
= control target key start
LH: loop header
LB: loop body
LE: loop exit
PB: predicated region body
PF: predicated region fallthrough
CT: control target
= control target key end

     0   :  { %s1358_s0 = inlined_call_operand.vmem [shape: f32[2,16,4,4], index: 0, kind: input, shape index: {}]   ;;  %s1359_s1 = inlined_call_operand.vmem [shape: f32[2,16,4,4], index: 1, kind: input, shape index: {}]   ;;  %s1360_s2 = inlined_call_operand.vmem [shape: f32[2,16,4,4], index: 2, kind: output, shape index: {0}]   ;;  %s1361_s3 = inlined_call_operand.vmem [shape: f32[2,16,4,4], index: 3, kind: output, shape index: {1}]   ;;  %s1362_s4 = inlined_call_operand.hbm [shape: s32[2,16,4], index: 4, kind: output, shape index: {2}]   ;;  %s1363_s5 = inlined_call_operand.vmem [shape: s32[2,16,4], index: 5, kind: output, shape index: {3}]  }
   0x1   :  { %1372 = sst [smem:[#allocation17_spill]] %s1358_s0 }
   0x2   :  { %1373 = sst [smem:[#allocation18_spill]] %s1359_s1 }
   0x3   :  { %1374 = sst [smem:[#allocation19_spill]] %s1362_s4 }
   0x4   :  { %7 = vsyncpa [#allocation9], 0 }
   0x5   :  { %9 = vsyncpa [#allocation9 + $0x1], 0  ;;  %s1077_s18 = smov 0   ;;  %s1079_s19 = smov 0  }
   0x6   :  { %s1081_s20 = smov 0   ;;  %s1083_s21 = smov 0  }
   0x7   :  { %s1085_s22 = smov 0   ;;  %s1087_s23 = smov 0  }
   0x8   :  { %s1089_s24 = smov 0   ;;  %s1091_s25 = smov 0  }
   0x9 LB: > { %1375 = sst [smem:[#allocation13_spill]] %s1032_s23  ;;  %s1364_s26 = sadd.s32 4294967295, %s1040_s25   ;;  %s1040_s25 = sphi %s1091_s25, %s15_s25   ;;  %s1036_s24 = sphi %s1089_s24, %s1397_s24   ;;  %s1032_s23 = sphi %s1087_s23, %s1396_s23   ;;  %s1028_s22 = sphi %s1085_s22, %s1395_s22   ;;  %s1024_s21 = sphi %s1083_s21, %s1394_s21   ;;  %s1020_s20 = sphi %s1081_s20, %s1400_s20   ;;  %s1016_s19 = sphi %s1079_s19, %s1399_s19   ;;  %s1012_s18 = sphi %s1077_s18, %s1398_s18  }
   0xa   : > { %1376 = sst [smem:[#allocation14_spill]] %s1036_s24  ;;  %s825_s27 = sadd.s32 4294967294, %s1040_s25  }
   0xb   : > { %s24_s28 = sadd.s32 1, %s1032_s23  ;;  %s27_s29 = sadd.s32 1, %s1036_s24 }
   0xc   : > { %p25_p0 = scmp.ge.s32.totalorder %s24_s28, 16  ;;  %s31_s30 = sshrl.u32 %s1032_s23, 3 }
   0xd   : > { %p48_p1 = scmp.ne.s32.totalorder %s1020_s20, %s1016_s19  ;;  %p49_p2 = scmp.eq.s32.totalorder %s1364_s26, 31 }
   0xe   : > { %s1402_s28 = smov (%p25_p0, %s24_s28), 0  ;;  %s1404_s29 = smov (!%p25_p0, %s27_s29), %s1036_s24 }
   0xf   : > { %1377 = sst [smem:[#allocation15_spill]] %s1402_s28  ;;  %s32_s6 = sshrl.u32 %s1402_s28, 3 }
  0x10   : > { %p29_p3 = scmp.ge.s32.totalorder %s1404_s29, 2  ;;  %s34_s7 = ssub.s32 %s31_s30, %s32_s6 }
  0x11   : > { %p1130_p4 = por %p49_p2, %p48_p1  ;;  %p54_p5 = scmp.ne.s32.totalorder %s1016_s19, %s1012_s18 }
  0x12   : > { %s1406_s29 = smov (%p29_p3, %s1404_s29), 0  ;;  %p55_p6 = scmp.eq.s32.totalorder %s825_s27, 31 }
  0x13   : > { %1379 = sst [smem:[#allocation16_spill]] %s1406_s29  ;;  %s33_s9 = ssub.s32 %s1036_s24, %s1406_s29 }
  0x14   : > { %s38_s10 = sadd.s32 1, %s1020_s20  ;;  %s35_s11 = sor.u32 %s34_s7, %s33_s9 }
  0x15   : > { %p1141_p7 = por %p55_p6, %p54_p5  ;;  %p36_p8 = scmp.eq.s32.totalorder %s35_s11, 0 }
  0x16   : > { %p827_p9 = scmp.ge.s32.totalorder %s1040_s25, 32 }
  0x17   : > { %s1146_s13 = scalar_select %p36_p8, %s1020_s20, %s38_s10  }
  0x18   : > { %101 = sbr.rel (%p827_p9) target bundleno = 36 (0x24), region = 16  ;;  %s103_s14 = sand.u32 (!%p827_p9), 1, %s1040_s25  }
  0x19   : > { %s829_s15 = sshll.u32 (!%p827_p9), %s1036_s24, 4  ;;  %s828_s16 = sshll.u32 (!%p827_p9), %s103_s14, 2 }
  0x1a   : > { %s107_s17 = sadd.s32 (!%p827_p9), %s1032_s23, %s829_s15  ;;  %s1381_s0 = sld [smem:[#allocation17_spill]] (!%p827_p9) }
  0x1b   : > { %s830_s27 = sshll.u32 (!%p827_p9), %s107_s17, 2  ;;  %s1382_s1 = sld [smem:[#allocation18_spill]] (!%p827_p9) }
  0x1c   : > { %s105_s26 = scalar_lea.vmem (!%p827_p9), [#allocation1], %s828_s16  ;;  %s146_s29 = scalar_lea.vmem (!%p827_p9), [#allocation3], %s828_s16 }
  0x20   : > { %s109_s7 = scalar_lea.vmem %s1381_s0, %s830_s27 }
  0x21   : > { %v126_v0 = vld [vmem:[%s109_s7] sm:$0xf]  ;;  %s150_s10 = scalar_lea.vmem %s1382_s1, %s830_s27 }
  0x22   : > { %127 = vst [vmem:[%s105_s26] sm:$0xf] %v126_v0  ;;  %v167_v1 = vld [vmem:[%s150_s10] sm:$0xf] }
  0x23   : > { %168 = vst [vmem:[%s146_s29] sm:$0xf] %v167_v1 }
  0x24 PF: > { %p834_p10 = scmp.ge.s32.totalorder %s1040_s25, 1  ;;  %p185_p11 = scmp.lt.s32.totalorder %s1040_s25, 33 }
  0x26   : > { %p186_p12 = pnand %p834_p10, %p185_p11 }
  0x28   : > { %189 = sbr.rel (%p186_p12) target bundleno = 527 (0x20f), region = 80 }
  0x2d   : > { %s1383_s14 = sadd.s32 4294967295, %s1040_s25   ;;  %s1367_s17 = sand.u32 1, %s1016_s19   ;;  %v247_v2 = vlaneseq  ;;  %v1046_v6 = vmov 0  }
  0x2e   : > { %s200_s15 = sand.u32 1, %s1383_s14   ;;  %s1167_s26 = sshll.u32 %s1367_s17, 3 }
  0x2f   : > { %s1163_s27 = sshll.u32 %s200_s15, 2  ;;  %v1170_v3 = vshrl.u32 %v247_v2, 7  ;;  %s242_s30 = sand.u32 7, %s1024_s21  }
  0x30   : > { %s202_s29 = scalar_lea.vmem [#allocation1], %s1163_s27  ;;  %s206_s16 = scalar_lea.vmem [#allocation3], %s1163_s27 }
  0x31   : > { %v230_v4 = vld [vmem:[%s202_s29] sm:$0xf]  ;;  %v234_v5 = vld [vmem:[%s206_s16] sm:$0xf]  ;;  %s221_s6 = scalar_lea.vmem [#allocation8], %s1167_s26  ;;  %s1366_s9 = scalar_lea.vmem [#allocation10], %s1167_s26 }
  0x32   : > { %231 = vst [vmem:[#allocation0] sm:$0xf] %v230_v4  ;;  %s1178_s7 = scalar_lea.vmem %s221_s6, %s242_s30 [#allocation8]  ;;  %s1183_s11 = scalar_lea.vmem %s1366_s9, %s242_s30 [#allocation10] }
  0x33   : > { %235 = vst [vmem:[#allocation2] sm:$0xf] %v234_v5  ;;  %s1189_s15 = smov 0  }
  0x34   : > { %251 = vst [vmem:[#allocation11] sm:$0xff] %v1170_v3 }
  0x35   : > { %246 = vst [vmem:[%s1178_s7] sm:$0x1] %v1046_v6 }
  0x39   : > { %v238_v7 = vld [vmem:[#allocation0] sm:$0xff] }
  0x3a   : > { %239 = vst [vmem:[#allocation4] sm:$0xff] %v238_v7  ;;  %v240_v8 = vld [vmem:[#allocation2] sm:$0xff] }
  0x3b   : > { %241 = vst [vmem:[#allocation6] sm:$0xff] %v240_v8 }
  0x3c LB: >> { %vm270_vm0 = vcmp.lt.s32.totalorder %v1170_v3, 4  ;;  %v1196_v13 = vstv %s1044_s15  ;;  %s311_s29 = ssub.s32 128, %s1044_s15  ;;  %v1204_v45 = vand.u32 127, %v247_v2  ;;  %s323_s30 = scalar_lea.vmem [#allocation4], %s1044_s15  ;;  %v320_v51 = vld [vmem:[%s1178_s7] ss:$0 sm:$0xff]  ;;  %s1044_s15 = sphi %s1189_s15, %s257_s15  }
  0x3d   : >> { %vm269_vm1 = vcmp.ge.s32.totalorder %v1170_v3, %v1196_v13  ;;  %s324_s9 = scalar_lea.vmem [#allocation6], %s1044_s15 }
  0x3e   : >> { %vm271_vm2 = vmand %vm269_vm1, %vm270_vm0  ;;  %vm318_vm12 = vcmp.eq.s32.totalorder %v1204_v45, %v1196_v13  ;;  %vm360_vm0 = vcmp.gt.s32.totalorder %v1170_v3, %v1196_v13 }
  0x41   : >> { %v262_v9 = vld [vmem:[#allocation4] sm:$0xff] }
  0x42   : >> { %v263_v10 = vld [vmem:[#allocation6] sm:$0xff]  ;;  %v264_v11 = vand.u32 2147483647, %v262_v9  ;;  %v327_v46 = vld [vmem:[%s323_s30] ss:$0 sm:$0xff] }
  0x43   : >> { %v265_v12 = vand.u32 2147483647, %v263_v10  ;;  %v328_v47 = vld [vmem:[%s324_s9] ss:$0 sm:$0xff] }
  0x45   : >> { %v266_v14 = vadd.f32 %v265_v12, %v264_v11 }
  0x47   : >> { %vm841_vm3 = vcmp.gt.f32.partialorder %v266_v14, -inf }
  0x48   : >> { %vm273_vm4 = vmand %vm271_vm2, %vm841_vm3 }
  0x49   : >> { %v274_v15 = vsel %vm273_vm4, %v1170_v3, %v1196_v13  ;;  %v275_v16 = vsel %vm273_vm4, %v266_v14, -inf }
  0x4a   : >> { %v276_v17 = vrot.slane %v275_v16, 1  ;;  %v277_v18 = vrot.slane %v274_v15, 1 }
  0x4c   : >> { %vm278_vm5 = vcmp.ge.f32.partialorder %v276_v17, %v275_v16  ;;  %v281_v19 = vrot.slane %v276_v17, 1  ;;  %v282_v20 = vrot.slane %v277_v18, 1 }
  0x4d   : >> { %v279_v21 = vsel %vm278_vm5, %v276_v17, %v275_v16  ;;  %v280_v22 = vsel %vm278_vm5, %v277_v18, %v274_v15 }
  0x4e   : >> { %vm283_vm6 = vcmp.ge.f32.partialorder %v281_v19, %v279_v21  ;;  %v286_v23 = vrot.slane %v281_v19, 1  ;;  %v287_v24 = vrot.slane %v282_v20, 1 }
  0x4f   : >> { %v284_v25 = vsel %vm283_vm6, %v281_v19, %v279_v21  ;;  %v285_v26 = vsel %vm283_vm6, %v282_v20, %v280_v22 }
  0x50   : >> { %vm288_vm7 = vcmp.ge.f32.partialorder %v286_v23, %v284_v25  ;;  %v291_v27 = vrot.slane %v286_v23, 1  ;;  %v292_v28 = vrot.slane %v287_v24, 1 }
  0x51   : >> { %v289_v29 = vsel %vm288_vm7, %v286_v23, %v284_v25  ;;  %v290_v30 = vsel %vm288_vm7, %v287_v24, %v285_v26 }
  0x52   : >> { %vm293_vm8 = vcmp.ge.f32.partialorder %v291_v27, %v289_v29  ;;  %v296_v31 = vrot.slane %v291_v27, 1  ;;  %v297_v32 = vrot.slane %v292_v28, 1 }
  0x53   : >> { %v294_v33 = vsel %vm293_vm8, %v291_v27, %v289_v29  ;;  %v295_v34 = vsel %vm293_vm8, %v292_v28, %v290_v30 }
  0x54   : >> { %vm298_vm9 = vcmp.ge.f32.partialorder %v296_v31, %v294_v33  ;;  %v301_v35 = vrot.slane %v296_v31, 1  ;;  %v302_v36 = vrot.slane %v297_v32, 1 }
  0x55   : >> { %v299_v37 = vsel %vm298_vm9, %v296_v31, %v294_v33  ;;  %v300_v38 = vsel %vm298_vm9, %v297_v32, %v295_v34 }
  0x56   : >> { %vm303_vm10 = vcmp.ge.f32.partialorder %v301_v35, %v299_v37  ;;  %v306_v39 = vrot.slane %v301_v35, 1  ;;  %v307_v40 = vrot.slane %v302_v36, 1 }
  0x57   : >> { %v304_v41 = vsel %vm303_vm10, %v301_v35, %v299_v37  ;;  %v305_v42 = vsel %vm303_vm10, %v302_v36, %v300_v38 }
  0x58   : >> { %vm308_vm11 = vcmp.ge.f32.partialorder %v306_v39, %v304_v41 }
  0x59   : >> { %v310_v43 = vsel %vm308_vm11, %v307_v40, %v305_v42 }
  0x5a   : >> { %312 = vrot.lane.b32.xlu0 %v310_v43, %s311_s29  ;;  %s335_s29 = scalar_lea.vmem [#allocation11], %s1044_s15  ;;  %s257_s15 = sadd.s32 1, %s1044_s15  }
  0x5b   : >> { %v337_v52 = vld [vmem:[%s335_s29] ss:$0 sm:$0xff]  ;;  %p254_p13 = scmp.ge.s32.totalorder %s257_s15, 4  }
  0x5c   : > { %s1386_s4 = sld [smem:[#allocation19_spill]] (%p254_p13)  ;;  %s1387_s0 = sand.u32 (%p254_p13), 1, %s1016_s19  }
  0x5d   : > { %s520_s1 = scalar_lea.sflag (%p254_p13), [#allocation9], %s1387_s0 }
  0x62   : > { %s962_s23 = scalar_lea.hbm (%p254_p13), %s1386_s4, 32 }
  0xcc   : >> { %v313_v44 = vpop.permute.xlu0 %312 }
  0xcd   : >> { %856 = vpush %v313_v44 }
  0xfe   : >> { %s857_s16 = spop %856 }
  0xff   : >> { %s325_s14 = scalar_lea.vmem [#allocation4], %s857_s16  ;;  %s326_s10 = scalar_lea.vmem [#allocation6], %s857_s16  ;;  %v319_v50 = vstv %s857_s16 }
 0x100   : >> { %v1208_v48 = vld [vmem:[%s325_s14] ss:$0 sm:$0xff]  ;;  %s336_s17 = scalar_lea.vmem [#allocation11], %s857_s16  ;;  %v321_v56 = vsel %vm318_vm12, %v319_v50, %v320_v51 }
 0x101   : >> { %v1210_v49 = vld [vmem:[%s326_s10] ss:$0 sm:$0xff]  ;;  %331 = vst [vmem:[%s325_s14] sm:$0x1] %v327_v46  ;;  %vm341_vm13 = vcmp.ne.f32.partialorder %v1208_v48, 0.0 }
 0x102   : >> { %vm342_vm14 = vcmp.ne.f32.partialorder %v1210_v49, 0.0  ;;  %332 = vst [vmem:[%s326_s10] sm:$0x1] %v328_v47  ;;  %v338_v53 = vld [vmem:[%s336_s17] ss:$0 sm:$0xff] }
 0x103   : >> { %vm343_vm15 = vmor %vm341_vm13, %vm342_vm14  ;;  %333 = vst [vmem:[%s323_s30] sm:$0x1] %v1208_v48 }
 0x104   : >> { %vm344_vm1 = vmand %vm318_vm12, %vm343_vm15  ;;  %334 = vst [vmem:[%s324_s9] sm:$0x1] %v1210_v49  ;;  %s850_s9 = sshll.u32 (%p254_p13), %s1028_s22, 1 }
 0x105   : >> { %v345_v54 = vsel %vm344_vm1, %v1208_v48, 1.0  ;;  %v346_v55 = vsel %vm344_vm1, %v1210_v49, 0.0  ;;  %339 = vst [vmem:[%s336_s17] sm:$0x1] %v337_v52  ;;  %vm430_vm15 = vmand %vm360_vm0, %vm318_vm12  ;;  %s605_s17 = sshrl.u32 (%p254_p13), %s1024_s21, 3 }
 0x106   : >> { %v1233_v57 = vsel %vm360_vm0, %v345_v54, 1.0  ;;  %v1238_v58 = vsel %vm360_vm0, %v346_v55, 0.0  ;;  %340 = vst [vmem:[%s335_s29] sm:$0x1] %v338_v53  ;;  %s1282_s10 = sadd.s32 (%p254_p13), %s850_s9, %s605_s17 }
 0x107   : >> { %v365_v59 = vand.u32 2147483647, %v1233_v57  ;;  %v366_v60 = vand.u32 2147483647, %v1238_v58  ;;  %322 = vst [vmem:[%s1178_s7] sm:$0x1] %v321_v56  ;;  %vm416_vm11 = vcmp.eq.f32.partialorder %v1233_v57, 0.0 }
 0x108   : >> { %vm417_vm13 = vcmp.eq.f32.partialorder %v1238_v58, 0.0  ;;  %s1371_s14 = sshll.u32 (%p254_p13), %s1282_s10, 3  ;;  %s613_s7 = sshll.u32 (%p254_p13), %s221_s6, 4  ;;  %s614_s7 = int_to_ptr.vmem [resolvable:$true] %s613_s7 }
 0x109   : >> { %vm1243_vm2 = vcmp.lt.f32.partialorder %v365_v59, %v366_v60  ;;  %s611_s15 = scalar_lea.hbm (%p254_p13), %s1386_s4, %s1371_s14 }
 0x10a   : >> { %v369_v62 = vsel %vm1243_vm2, %v1238_v58, %v1233_v57  ;;  %v368_v10 = vsel %vm1243_vm2, %v1233_v57, %v1238_v58  ;;  %v356_v20 = vld [vmem:[#allocation4] sm:$0xff]  ;;  %s615_s29 = sshll.u32 (%p254_p13), %s611_s15, 4  ;;  %s616_s29 = int_to_ptr.hbm [resolvable:$true] %s615_s29 }
 0x10b   : >> { %938 = vrcp.f32 %v369_v62  ;;  %v381_v4 = vand.u32 2147483648, %v369_v62  ;;  %v379_v6 = vand.u32 2147483647, %v369_v62  ;;  %vm375_vm4 = vweird.f32 %v369_v62  ;;  %v357_v21 = vld [vmem:[#allocation6] sm:$0xff]  ;;  %s956_s28 = sshra.s32 (%p254_p13), %s616_s29, 4  ;;  %s957_s28 = int_to_ptr.hbm [resolvable:$true] %s956_s28 }
 0x10c   : >> { %v421_v27 = vand.u32 2147483648, %v357_v21  ;;  %v419_v28 = vand.u32 2147483648, %v356_v20  ;;  %vm425_vm14 = vcmp.eq.f32.partialorder %v357_v21, 0.0  ;;  %vm423_vm1 = vcmp.eq.f32.partialorder %v356_v20, 0.0  ;;  %s958_s24 = scalar_lea.hbm (%p254_p13), %s957_s28, 8  ;;  %p963_p3 = scmp.lt.s32.totalorder (%p254_p13), %s957_s28, %s1386_s4 }
 0x10d   : >> { %v382_v8 = vor.u32 1.1754944e-38, %v381_v4  ;;  %vm380_vm6 = vcmp.eq.f32.partialorder %v379_v6, 8.507059e+37  ;;  %p959_p0 = scmp.ne.s32.totalorder (%p254_p13), %s957_s28, %s958_s24  ;;  %p964_p5 = scmp.lt.s32.totalorder (%p254_p13), %s962_s23, %s958_s24 }
 0x10e   : >> { %v422_v37 = vor.u32 inf, %v421_v27  ;;  %v420_v38 = vor.u32 inf, %v419_v28 }
 0x10f   : > { %p960_p1 = pnand (%p254_p13), %p959_p0, %p1130_p4  ;;  %p965_p6 = por (%p254_p13), %p964_p5, %p963_p3 }
 0x110   : >> { %v426_v46 = vsel %vm425_vm14, nan, %v422_v37  ;;  %v424_v47 = vsel %vm423_vm1, nan, %v420_v38 }
 0x111   : >> { %v939_v63 = vpop.eup %938  ;;  %p961_p2 = pneg (%p254_p13), %p960_p1 }
 0x112   : >> { %v371_v0 = vmul.f32 %v939_v63, %v369_v62  ;;  %vm376_vm3 = vweird.f32 %v939_v63 }
 0x113   : >> { %vm377_vm5 = vmor %vm375_vm4, %vm376_vm3  ;;  %p966_p8 = pnand (%p254_p13), %p965_p6, %p961_p2 }
 0x114   : >> { %v372_v1 = vsub.f32 1.0, %v371_v0  ;;  %vm418_vm3 = vmand %vm416_vm11, %vm417_vm13 }
 0x116   : >> { %v373_v5 = vmul.f32 %v939_v63, %v372_v1 }
 0x118   : >> { %v374_v7 = vadd.f32 %v939_v63, %v373_v5 }
 0x11a   : >> { %v378_v9 = vsel %vm377_vm5, %v939_v63, %v374_v7 }
 0x11b   : >> { %v383_v11 = vsel %vm380_vm6, %v382_v8, %v378_v9 }
 0x11c   : >> { %v384_v12 = vmul.f32 %v383_v11, %v368_v10 }
 0x11e   : >> { %v385_v14 = vmul.f32 %v384_v12, %v1233_v57  ;;  %v387_v15 = vmul.f32 %v384_v12, %v1238_v58  ;;  %v389_v23 = vmul.f32 %v384_v12, %v356_v20  ;;  %v391_v24 = vmul.f32 %v384_v12, %v357_v21 }
 0x120   : >> { %v386_v16 = vadd.f32 %v385_v14, %v1238_v58  ;;  %v388_v17 = vadd.f32 %v387_v15, %v1233_v57  ;;  %v411_v31 = vsub.f32 %v391_v24, %v356_v20  ;;  %v413_v32 = vsub.f32 %v357_v21, %v389_v23 }
 0x121   : >> { %v390_v33 = vadd.f32 %v389_v23, %v357_v21  ;;  %v392_v34 = vadd.f32 %v391_v24, %v356_v20 }
 0x122   : >> { %v394_v18 = vsel %vm1243_vm2, %v386_v16, %v388_v17  ;;  %v414_v41 = vsel %vm1243_vm2, %v411_v31, %v413_v32 }
 0x123   : >> { %940 = vrcp.f32 %v394_v18  ;;  %v406_v26 = vand.u32 2147483648, %v394_v18  ;;  %v404_v30 = vand.u32 2147483647, %v394_v18  ;;  %vm400_vm8 = vweird.f32 %v394_v18 }
 0x124   : >> { %v393_v42 = vsel %vm1243_vm2, %v390_v33, %v392_v34  ;;  %vm350_vm2 = vcmp.gt.s32.totalorder %v1204_v45, %v1196_v13  ;;  %v450_v13 = vld [vmem:[#allocation11] sm:$0xff] (%p254_p13) }
 0x125   : >> { %v407_v36 = vor.u32 1.1754944e-38, %v406_v26  ;;  %vm405_vm10 = vcmp.eq.f32.partialorder %v404_v30, 8.507059e+37  ;;  %v351_v54 = vsel %vm350_vm2, %v1208_v48, 0.0  ;;  %v352_v55 = vsel %vm350_vm2, %v1210_v49, 0.0 }
 0x129   : >> { %v941_v19 = vpop.eup %940 }
 0x12a   : >> { %v396_v22 = vmul.f32 %v941_v19, %v394_v18  ;;  %vm401_vm7 = vweird.f32 %v941_v19 }
 0x12b   : >> { %vm402_vm9 = vmor %vm400_vm8, %vm401_vm7 }
 0x12c   : >> { %v397_v25 = vsub.f32 1.0, %v396_v22 }
 0x12e   : >> { %v398_v29 = vmul.f32 %v941_v19, %v397_v25 }
 0x130   : >> { %v399_v35 = vadd.f32 %v941_v19, %v398_v29 }
 0x132   : >> { %v403_v39 = vsel %vm402_vm9, %v941_v19, %v399_v35 }
 0x133   : >> { %v408_v40 = vsel %vm405_vm10, %v407_v36, %v403_v39 }
 0x134   : >> { %v415_v43 = vmul.f32 %v414_v41, %v408_v40  ;;  %v409_v44 = vmul.f32 %v408_v40, %v393_v42 }
 0x136   : >> { %v428_v50 = vsel %vm418_vm3, %v426_v46, %v415_v43  ;;  %v427_v51 = vsel %vm418_vm3, %v424_v47, %v409_v44 }
 0x137   : >> { %v432_v52 = vsel %vm430_vm15, %v428_v50, 0.0  ;;  %v431_v53 = vsel %vm430_vm15, %v427_v51, 0.0 }
 0x138   : >> { %435 = vadd.xlane.f32.xlu1 %v432_v52  ;;  %433 = vadd.xlane.f32.xlu0 %v431_v53 }
 0x161   : > { %466 = vxpose.xlu0.b32.start.end [1/1] (short) (narrow) (%p254_p13), %v450_v13, 8 }
 0x1ab   : >> { %v436_v56 = vpop.xlane.xlu1 %435  ;;  %v434_v57 = vpop.xlane.xlu0 %433 }
 0x1ac   : >> { %v440_v58 = vmul.f32 %v436_v56, %v352_v55  ;;  %v443_v59 = vmul.f32 %v436_v56, %v351_v54  ;;  %v439_v60 = vmul.f32 %v434_v57, %v351_v54  ;;  %v442_v61 = vmul.f32 %v434_v57, %v352_v55 }
 0x1ae   : >> { %v441_v62 = vsub.f32 %v439_v60, %v440_v58  ;;  %v444_v63 = vadd.f32 %v443_v59, %v442_v61 }
 0x1af   : > { %256 = sbr.rel (!%p254_p13) target bundleno = 60 (0x3c), region = 284 }
 0x1b0   : >> { %v446_v0 = vsub.f32 %v427_v51, %v441_v62  ;;  %v447_v1 = vsub.f32 %v428_v50, %v444_v63 }
 0x1b2   : >> { %448 = vst [vmem:[#allocation4] sm:$0xff] %v446_v0 }
 0x1b3   : >> { %449 = vst [vmem:[#allocation6] sm:$0xff] %v447_v1 }
 0x1b4   : > { %969 = shalt.err (!%p966_p8)
}
 0x1b5   : > { %858 = dma.vmem_to_hbm [thread:$0]  (%p1130_p4), %s614_s7, 128, %s616_s29, %s520_s1  }
 0x1b6   : > { %s846_s0 = sshll.u32 %s1028_s22, 4  ;;  %s1388_s15 = scalar_lea.vmem [#allocation5], %s1163_s27 }
 0x1b7   : > { %s529_s6 = sadd.s32 %s1024_s21, %s846_s0  ;;  %s1389_s23 = scalar_lea.vmem [#allocation7], %s1163_s27 }
 0x1b8   : > { %s847_s24 = sshll.u32 %s529_s6, 2  ;;  %s1390_s4 = smov %s1388_s15 }
 0x1b9   : > { %v501_v2 = vld [vmem:[#allocation4] sm:$0xf]  ;;  %s531_s9 = scalar_lea.vmem %s1360_s2, %s847_s24  ;;  %s568_s14 = scalar_lea.vmem %s1361_s3, %s847_s24 }
 0x1ba   : > { %v507_v3 = vld [vmem:[#allocation6] sm:$0xf]  ;;  %504 = vst [vmem:[%s1388_s15] sm:$0xf] %v501_v2  ;;  %s1391_s1 = smov %s1389_s23  ;;  %s1392_s21 = sshll.u32 (%p1130_p4), %s1282_s10, 3 }
 0x1bb   : > { %510 = vst [vmem:[%s1389_s23] sm:$0xf] %v507_v3  ;;  %s626_s29 = scalar_lea.vmem (%p1130_p4), %s1363_s5, %s1392_s21  ;;  %s1393_s0 = scalar_lea.vmem (%p1130_p4), [#allocation10], %s1167_s26 }
 0x1c1   : > { %v548_v45 = vld [vmem:[%s1390_s4] sm:$0xf] }
 0x1c2   : > { %549 = vst [vmem:[%s531_s9] sm:$0xf] %v548_v45  ;;  %v585_v48 = vld [vmem:[%s1391_s1] sm:$0xf] }
 0x1c3   : > { %586 = vst [vmem:[%s568_s14] sm:$0xf] %v585_v48 }
 0x202   : > { %621 = sbr.rel (!%p1130_p4) target bundleno = 527 (0x20f), region = 156 }
 0x205   : > { %v482_v49 = vpop.trf.xlu0 }
 0x206   : > { %498 = vst [vmem:[%s1183_s11] sm:$0x1] %v482_v49 }
 0x20d   : > { %v655_v4 = vld [vmem:[%s1393_s0] sm:$0xff] }
 0x20e   : > { %656 = vst [vmem:[%s626_s29] sm:$0xff] %v655_v4 }
 0x20f PF: > { %p864_p9 = scmp.ge.s32.totalorder %s1040_s25, 2  ;;  %s676_s4 = sand.u32 1, %s1012_s18  }
 0x210   : > { %s677_s8 = scalar_lea.sflag [#allocation9], %s676_s4 }
 0x211   : > { %p861_p10 = pnand %p864_p9, %p1141_p7 }
 0x213   : > { %p862_p4 = pneg %p861_p10 }
 0x215   : > { %1007 = dma.done.wait (%p862_p4), %s677_s8, 128  }
 0x216   : > { %1009 = vsyncadd (%p862_p4), %s677_s8, 4294967168  ;;  %s15_s25 = sadd.s32 1, %s1040_s25   ;;  %s1394_s21 = sld [smem:[#allocation13_spill]] }
 0x217   : > { %p12_p11 = scmp.ge.s32.totalorder %s15_s25, 34   ;;  %s1395_s22 = sld [smem:[#allocation14_spill]] }
 0x218   : > { %s1396_s23 = sld [smem:[#allocation15_spill]]  ;;  %s1398_s18 = smov %s1016_s19 }
 0x219   : > { %s1397_s24 = sld [smem:[#allocation16_spill]]  ;;  %s1399_s19 = smov %s1020_s20 }
 0x21a   : > { %s1400_s20 = smov %s1146_s13  ;;  %14 = sbr.rel (!%p12_p11) target bundleno = 9 (0x9), region = 295 }
 0x21f   :  { %690 = vsyncpa [#allocation9], 1 }
 0x220   :  { %692 = vsyncpa [#allocation9 + $0x1], 1 }

// kernel: custom-call.4
= control target key start
LH: loop header
LB: loop body
LE: loop exit
PB: predicated region body
PF: predicated region fallthrough
CT: control target
= control target key end

     0   :  { %2 = vsyncpa [#allocation0], 0  ;;  %s55_s0 = inlined_call_operand.hbm [shape: c64[2,4,16,8], index: 0, kind: input, shape index: {}]   ;;  %s56_s1 = inlined_call_operand.vmem [shape: f32[2,4,16,8], index: 1, kind: output, shape index: {}]  }
   0x1   :  { %s4_s8 = sshll.u32 %s55_s0, 4  ;;  %s6_s11 = sshll.u32 %s56_s1, 4  ;;  %s5_s8 = int_to_ptr.hbm [resolvable:$true] %s4_s8  ;;  %s7_s11 = int_to_ptr.vmem [resolvable:$true] %s6_s11 }
   0x2   :  { %9 = dma.hbm_to_vmem [thread:$0]  %s5_s8, 1024, %s7_s11, [#allocation0] }
   0x3   :  { %37 = dma.done.wait [#allocation0], 1024  }
   0x4   :  { %38 = vsyncadd [#allocation0], 4294966272 }
   0x5   :  { %12 = vsyncpa [#allocation0], 1 }

// kernel: custom-call.5
= control target key start
LH: loop header
LB: loop body
LE: loop exit
PB: predicated region body
PF: predicated region fallthrough
CT: control target
= control target key end

     0   :  { %s56_s0 = inlined_call_operand.hbm [shape: c64[2,4,16,8], index: 0, kind: input, shape index: {}]   ;;  %s57_s1 = inlined_call_operand.vmem [shape: f32[2,4,16,8], index: 1, kind: output, shape index: {}]  }
   0x1   :  { %s2_s8 = scalar_lea.hbm %s56_s0, 64 }
   0x2   :  { %3 = vsyncpa [#allocation0], 0  ;;  %s5_s9 = sshll.u32 %s2_s8, 4  ;;  %s7_s12 = sshll.u32 %s57_s1, 4  ;;  %s6_s9 = int_to_ptr.hbm [resolvable:$true] %s5_s9  ;;  %s8_s12 = int_to_ptr.vmem [resolvable:$true] %s7_s12 }
   0x3   :  { %10 = dma.hbm_to_vmem [thread:$0]  %s6_s9, 1024, %s8_s12, [#allocation0] }
   0x4   :  { %38 = dma.done.wait [#allocation0], 1024  }
   0x5   :  { %39 = vsyncadd [#allocation0], 4294966272 }
   0x6   :  { %13 = vsyncpa [#allocation0], 1 }

// kernel: custom-call.8
= control target key start
LH: loop header
LB: loop body
LE: loop exit
PB: predicated region body
PF: predicated region fallthrough
CT: control target
= control target key end

     0   :  { %s111_s0 = inlined_call_operand.vmem [shape: f32[2,16,8], index: 0, kind: input, shape index: {}]   ;;  %s112_s1 = inlined_call_operand.vmem [shape: f32[2,16,8], index: 1, kind: input, shape index: {}]   ;;  %s113_s2 = inlined_call_operand.vmem [shape: c64[2,16,8], index: 2, kind: output, shape index: {}]  }
   0x1   :  { %v4_v0 = vld [vmem:[%s111_s0] sm:$0xff]  ;;  %v35_v1 = vld [vmem:[%s111_s0 + $0x8] sm:$0xff]  ;;  %v37_v2 = vld [vmem:[%s111_s0 + $0x10] sm:$0xff] }
   0x2   :  { %5 = vst [vmem:[%s113_s2] sm:$0xff] %v4_v0  ;;  %v39_v3 = vld [vmem:[%s111_s0 + $0x18] sm:$0xff]  ;;  %v18_v4 = vld [vmem:[%s112_s1] sm:$0xff]  ;;  %v42_v5 = vld [vmem:[%s112_s1 + $0x8] sm:$0xff] }
   0x3   :  { %36 = vst [vmem:[%s113_s2 + $0x8] sm:$0xff] %v35_v1  ;;  %v44_v6 = vld [vmem:[%s112_s1 + $0x10] sm:$0xff]  ;;  %v46_v7 = vld [vmem:[%s112_s1 + $0x18] sm:$0xff] }
   0x4   :  { %38 = vst [vmem:[%s113_s2 + $0x10] sm:$0xff] %v37_v2 }
   0x5   :  { %40 = vst [vmem:[%s113_s2 + $0x18] sm:$0xff] %v39_v3 }
   0x6   :  { %41 = vst [vmem:[%s113_s2 + $0x20] sm:$0xff] %v18_v4 }
   0x7   :  { %43 = vst [vmem:[%s113_s2 + $0x28] sm:$0xff] %v42_v5 }
   0x8   :  { %45 = vst [vmem:[%s113_s2 + $0x30] sm:$0xff] %v44_v6 }
   0x9   :  { %47 = vst [vmem:[%s113_s2 + $0x38] sm:$0xff] %v46_v7 }

// kernel: gevd_beamformer_forward.1
= control target key start
LH: loop header
LB: loop body
LE: loop exit
PB: predicated region body
PF: predicated region fallthrough
CT: control target
= control target key end

     0   :  { %s671_s9 = smov 0   ;;  %s673_s10 = smov 0   ;;  %s755_s0 = inlined_call_operand.vmem [shape: f32[2,8,16,1], index: 0, kind: input, shape index: {}]   ;;  %s756_s1 = inlined_call_operand.vmem [shape: f32[2,8,16,128], index: 1, kind: input, shape index: {}]   ;;  %s757_s2 = inlined_call_operand.vmem [shape: f32[2,2,16,128], index: 2, kind: output, shape index: {}]  }
   0x1   :  { %s675_s11 = smov 0  }
   0x2 LB: > { %s31_s12 = sadd.s32 1, %s649_s10  ;;  %p561_p0 = scmp.ge.s32.totalorder %s653_s11, 1  ;;  %s653_s11 = sphi %s675_s11, %s12_s11   ;;  %s649_s10 = sphi %s673_s10, %s759_s10   ;;  %s645_s9 = sphi %s671_s9, %s758_s9  }
   0x3   : > { %p33_p1 = scmp.ge.s32.totalorder %s31_s12, 2  ;;  %p164_p2 = scmp.lt.s32.totalorder %s653_s11, 3 }
   0x5   : > { %s761_s12 = smov (%p33_p1, %s31_s12), 0  ;;  %p165_p3 = pnand %p561_p0, %p164_p2 }
   0x6   : > { %p210_p4 = scmp.lt.s32.totalorder (!%p165_p3), %s645_s9, 1 }
   0x7   : > { %168 = sbr.rel (%p165_p3) target bundleno = 180 (0xb4), region = 28 }
   0xc   : > { %v655_v0 = vmov 0   ;;  %s763_s9 = smov (!%p210_p4, %s645_s9), 1 }
   0xd   : > { %630 = vset.pattern.permute.xlu2 %v655_v0  ;;  %629 = vset.pattern.permute.xlu1 %v655_v0  ;;  %s600_s13 = sshll.u32 %s763_s9, 7  ;;  %s602_s20 = sshll.u32 %s763_s9, 5 }
   0xe   : > { %628 = vset.pattern.permute.xlu0 %v655_v0  ;;  %s697_s16 = scalar_lea.vmem %s755_s0, %s600_s13  ;;  %s722_s19 = scalar_lea.vmem %s756_s1, %s600_s13 }
   0xf   : > { %v572_v1 = vld [vmem:[%s697_s16 + $0x20] sm:$0xff]  ;;  %v568_v2 = vld [vmem:[%s697_s16 + $0x10] sm:$0xff]  ;;  %v573_v4 = vld [vmem:[%s697_s16 + $0x28] sm:$0xff]  ;;  %s243_s23 = scalar_lea.vmem %s757_s2, %s602_s20 }
  0x10   : > { %v245_v3 = vld [vmem:[%s697_s16] sm:$0xff]  ;;  %301 = vperm.xlu2 %630, %v572_v1   ;;  %269 = vperm.xlu1 %629, %v568_v2   ;;  %v569_v5 = vld [vmem:[%s697_s16 + $0x18] sm:$0xff]  ;;  %v246_v6 = vld [vmem:[%s697_s16 + $0x8] sm:$0xff] }
  0x11   : > { %257 = vperm.xlu0 %628, %v245_v3   ;;  %v580_v7 = vld [vmem:[%s697_s16 + $0x40] sm:$0xff]  ;;  %v575_v8 = vld [vmem:[%s697_s16 + $0x38] sm:$0xff]  ;;  %v574_v9 = vld [vmem:[%s697_s16 + $0x30] sm:$0xff] }
  0x12   : > { %v583_v10 = vld [vmem:[%s697_s16 + $0x58] sm:$0xff]  ;;  %v582_v11 = vld [vmem:[%s697_s16 + $0x50] sm:$0xff]  ;;  %v581_v12 = vld [vmem:[%s697_s16 + $0x48] sm:$0xff] }
  0x13   : > { %v590_v13 = vld [vmem:[%s697_s16 + $0x70] sm:$0xff]  ;;  %v589_v14 = vld [vmem:[%s697_s16 + $0x68] sm:$0xff]  ;;  %v588_v15 = vld [vmem:[%s697_s16 + $0x60] sm:$0xff] }
  0x14   : > { %v591_v16 = vld [vmem:[%s697_s16 + $0x78] sm:$0xff]  ;;  %v250_v27 = vld [vmem:[%s722_s19] sm:$0xff]  ;;  %v570_v28 = vld [vmem:[%s722_s19 + $0x10] sm:$0xff] }
  0x15   : > { %v576_v29 = vld [vmem:[%s722_s19 + $0x20] sm:$0xff]  ;;  %v578_v30 = vld [vmem:[%s722_s19 + $0x30] sm:$0xff]  ;;  %v577_v43 = vld [vmem:[%s722_s19 + $0x28] sm:$0xff] }
  0x16   : > { %v584_v35 = vld [vmem:[%s722_s19 + $0x40] sm:$0xff]  ;;  %v586_v36 = vld [vmem:[%s722_s19 + $0x50] sm:$0xff]  ;;  %v579_v44 = vld [vmem:[%s722_s19 + $0x38] sm:$0xff] }
  0x17   : > { %v592_v47 = vld [vmem:[%s722_s19 + $0x60] sm:$0xff]  ;;  %v594_v48 = vld [vmem:[%s722_s19 + $0x70] sm:$0xff]  ;;  %v251_v52 = vld [vmem:[%s722_s19 + $0x8] sm:$0xff] }
  0x18   : > { %306 = vperm.xlu2 %630, %v573_v4   ;;  %274 = vperm.xlu1 %629, %v569_v5   ;;  %v571_v53 = vld [vmem:[%s722_s19 + $0x18] sm:$0xff]  ;;  %v585_v5 = vld [vmem:[%s722_s19 + $0x48] sm:$0xff] }
  0x19   : > { %262 = vperm.xlu0 %628, %v246_v6   ;;  %v587_v6 = vld [vmem:[%s722_s19 + $0x58] sm:$0xff] }
  0x20   : > { %349 = vperm.xlu2 %630, %v580_v7   ;;  %318 = vperm.xlu1 %629, %v575_v8  }
  0x21   : > { %313 = vperm.xlu0 %628, %v574_v9  }
  0x28   : > { %366 = vperm.xlu2 %630, %v583_v10   ;;  %361 = vperm.xlu1 %629, %v582_v11  }
  0x29   : > { %354 = vperm.xlu0 %628, %v581_v12  }
  0x30   : > { %409 = vperm.xlu2 %630, %v590_v13   ;;  %402 = vperm.xlu1 %629, %v589_v14  }
  0x31   : > { %397 = vperm.xlu0 %628, %v588_v15  }
  0x39   : > { %414 = vperm.xlu0 %628, %v591_v16  }
  0x6a   : > { %v302_v17 = vpop.permute.xlu2 %301 }
  0x6b   : > { %v309_v41 = vmul.f32 %v576_v29, %v302_v17  ;;  %v325_v42 = vmul.f32 %v578_v30, %v302_v17 }
  0x72   : > { %v307_v18 = vpop.permute.xlu2 %306 }
  0x73   : > { %v310_v56 = vmul.f32 %v577_v43, %v307_v18  ;;  %v326_v57 = vmul.f32 %v579_v44, %v307_v18 }
  0x7a   : > { %v350_v22 = vpop.permute.xlu2 %349 }
  0x7b   : > { %v357_v50 = vmul.f32 %v584_v35, %v350_v22  ;;  %v373_v51 = vmul.f32 %v586_v36, %v350_v22 }
  0x82   : > { %v270_v19 = vpop.permute.xlu1 %269  ;;  %v715_v26 = vpop.permute.xlu2 %366 }
  0x83   : > { %v258_v20 = vpop.permute.xlu0 %257  ;;  %v277_v37 = vmul.f32 %v570_v28, %v270_v19  ;;  %v283_v38 = vmul.f32 %v270_v19, %v250_v27  ;;  %v376_v22 = vmul.f32 %v585_v5, %v715_v26 }
  0x84   : > { %v265_v39 = vmul.f32 %v258_v20, %v250_v27  ;;  %v281_v40 = vmul.f32 %v570_v28, %v258_v20  ;;  %v593_v28 = vld [vmem:[%s722_s19 + $0x68] sm:$0xff] }
  0x86   : > { %v279_v58 = vadd.f32 %v277_v37, %v265_v39  ;;  %v285_v59 = vsub.f32 %v281_v40, %v283_v38 }
  0x8a   : > { %v275_v21 = vpop.permute.xlu1 %274  ;;  %v410_v49 = vpop.permute.xlu2 %409 }
  0x8b   : > { %v263_v23 = vpop.permute.xlu0 %262  ;;  %v417_v60 = vmul.f32 %v594_v48, %v410_v49  ;;  %v423_v61 = vmul.f32 %v592_v47, %v410_v49  ;;  %v278_v0 = vmul.f32 %v571_v53, %v275_v21  ;;  %v284_v1 = vmul.f32 %v275_v21, %v251_v52 }
  0x8c   : > { %v266_v11 = vmul.f32 %v263_v23, %v251_v52  ;;  %v282_v12 = vmul.f32 %v571_v53, %v263_v23  ;;  %v370_v21 = vmul.f32 %v587_v6, %v715_v26 }
  0x8e   : > { %v286_v27 = vsub.f32 %v282_v12, %v284_v1 }
  0x92   : > { %v319_v24 = vpop.permute.xlu1 %318 }
  0x93   : > { %v314_v25 = vpop.permute.xlu0 %313  ;;  %v322_v2 = vmul.f32 %v579_v44, %v319_v24  ;;  %v328_v3 = vmul.f32 %v577_v43, %v319_v24 }
  0x94   : > { %v321_v33 = vmul.f32 %v578_v30, %v314_v25  ;;  %v327_v34 = vmul.f32 %v576_v29, %v314_v25  ;;  %v280_v25 = vadd.f32 %v278_v0, %v266_v11  ;;  %v595_v29 = vld [vmem:[%s722_s19 + $0x78] sm:$0xff] }
  0x95   : > { %v324_v19 = vadd.f32 %v322_v2, %v310_v56  ;;  %v330_v20 = vsub.f32 %v326_v57, %v328_v3 }
  0x96   : > { %v323_v54 = vadd.f32 %v321_v33, %v309_v41  ;;  %v329_v55 = vsub.f32 %v325_v42, %v327_v34 }
  0x97   : > { %v332_v33 = vadd.f32 %v324_v19, %v280_v25  ;;  %v334_v34 = vadd.f32 %v330_v20, %v286_v27 }
  0x98   : > { %v331_v7 = vadd.f32 %v323_v54, %v279_v58  ;;  %v333_v8 = vadd.f32 %v329_v55, %v285_v59 }
  0x9a   : > { %v362_v31 = vpop.permute.xlu1 %361 }
  0x9b   : > { %v355_v32 = vpop.permute.xlu0 %354  ;;  %v369_v45 = vmul.f32 %v586_v36, %v362_v31  ;;  %v375_v46 = vmul.f32 %v584_v35, %v362_v31 }
  0x9c   : > { %v358_v13 = vmul.f32 %v585_v5, %v355_v32  ;;  %v374_v14 = vmul.f32 %v587_v6, %v355_v32 }
  0x9d   : > { %v371_v62 = vadd.f32 %v369_v45, %v357_v50  ;;  %v377_v63 = vsub.f32 %v373_v51, %v375_v46 }
  0x9e   : > { %v372_v31 = vadd.f32 %v370_v21, %v358_v13  ;;  %v378_v32 = vsub.f32 %v374_v14, %v376_v22 }
  0x9f   : > { %v379_v15 = vadd.f32 %v371_v62, %v331_v7  ;;  %v381_v16 = vadd.f32 %v377_v63, %v333_v8 }
  0xa0   : > { %v380_v40 = vadd.f32 %v372_v31, %v332_v33  ;;  %v382_v26 = vadd.f32 %v378_v32, %v334_v34 }
  0xa2   : > { %v403_v30 = vpop.permute.xlu1 %402 }
  0xa3   : > { %v398_v4 = vpop.permute.xlu0 %397  ;;  %v406_v36 = vmul.f32 %v593_v28, %v403_v30  ;;  %v422_v37 = vmul.f32 %v595_v29, %v403_v30 }
  0xa4   : > { %v405_v9 = vmul.f32 %v592_v47, %v398_v4  ;;  %v421_v10 = vmul.f32 %v594_v48, %v398_v4 }
  0xa6   : > { %v419_v17 = vadd.f32 %v417_v60, %v405_v9  ;;  %v425_v18 = vsub.f32 %v421_v10, %v423_v61 }
  0xa8   : > { %v427_v24 = vadd.f32 %v419_v17, %v379_v15  ;;  %v429_v23 = vadd.f32 %v425_v18, %v381_v16 }
  0xaa   : > { %431 = vst [vmem:[%s243_s23] sm:$0xff] %v427_v24 }
  0xab   : > { %596 = vst [vmem:[%s243_s23 + $0x10] sm:$0xff] %v429_v23  ;;  %v415_v35 = vpop.permute.xlu0 %414 }
  0xac   : > { %v418_v38 = vmul.f32 %v595_v29, %v415_v35  ;;  %v424_v39 = vmul.f32 %v593_v28, %v415_v35 }
  0xae   : > { %v420_v41 = vadd.f32 %v418_v38, %v406_v36  ;;  %v426_v42 = vsub.f32 %v422_v37, %v424_v39 }
  0xb0   : > { %v428_v43 = vadd.f32 %v420_v41, %v380_v40  ;;  %v430_v44 = vadd.f32 %v426_v42, %v382_v26 }
  0xb2   : > { %432 = vst [vmem:[%s243_s23 + $0x8] sm:$0xff] %v428_v43 }
  0xb3   : > { %597 = vst [vmem:[%s243_s23 + $0x18] sm:$0xff] %v430_v44 }
  0xb4 PF: > { %s12_s11 = sadd.s32 1, %s653_s11   ;;  %s758_s9 = smov %s649_s10 }
  0xb5   : > { %p9_p5 = scmp.ge.s32.totalorder %s12_s11, 4   ;;  %s759_s10 = smov %s761_s12 }
  0xb7   :  { %11 = sbr.rel (!%p9_p5) target bundleno = 2 (0x2), region = 76 }

</bundles_post_ra>
